<compile_context>
chip_gen: v7x
topology: tpu7x:2x2x1
jax: 0.10.0
libtpu: 0.0.40
codegen_flags: <defaults>
</compile_context>

<pallas_src>
import math

import jax
import jax.numpy as jnp
from jax.experimental import pallas as pl
from jax.experimental.pallas import tpu as pltpu

# ----- small ViT encoder_q hyper-parameters (synthetic, deterministic) -----
BATCH = 2
CHANNELS = 3
IMAGE = 16
PATCH = 8
DIM = 32            # hidden_dim == encoder_q.mlp_head[0].weight.shape[1]
DEPTH = 2
HEADS = 4
DIM_HEAD = 8
MLP_DIM = 64
NUM_CLASSES = 10
EPS = 1e-5

N_PATCHES = (IMAGE // PATCH) ** 2          # 4
SEQ = N_PATCHES + 1                        # 5 (cls + patches)
TOKENS = BATCH * SEQ                       # 10
PATCH_DIM = CHANNELS * PATCH * PATCH       # 192
INNER = HEADS * DIM_HEAD                   # 32
SCALE = DIM_HEAD ** -0.5

_SQRT_2_OVER_PI = math.sqrt(2.0 / math.pi)


# --------------------------- fused Pallas kernel ---------------------------

def _fused_vit_kernel(
    patches_ref, base_ref, bias_ref, patch_w_ref,
    ln1_g_ref, ln1_b_ref, qkv_w_ref, out_w_ref, out_b_ref,
    ln2_g_ref, ln2_b_ref, ff1_w_ref, ff1_b_ref, ff2_w_ref, ff2_b_ref,
    fln_g_ref, fln_b_ref, head_w_ref, head_b_ref,
    logits_ref,
):
    f32 = jnp.float32

    def layer_norm(x, g, b):
        mean = jnp.mean(x, axis=-1, keepdims=True)
        cent = x - mean
        var = jnp.mean(cent * cent, axis=-1, keepdims=True)  # biased, like torch LN
        return cent * jax.lax.rsqrt(var + EPS) * g + b

    def gelu(x):
        # TODO(synk): PyTorch nn.GELU() default is the exact erf form; the tanh
        # approximation is used to stay on well-supported Mosaic lowerings.
        u = _SQRT_2_OVER_PI * (x + 0.044715 * x * x * x)
        return 0.5 * x * (1.0 + jnp.tanh(u))

    # Patch embedding over the whole lane-dense (TOKENS, PATCH_DIM) slab.
    # cls rows are zero patches; patch_b / cls / pos are pre-folded into base.
    x = jnp.dot(patches_ref[...], patch_w_ref[...],
                preferred_element_type=f32) + base_ref[...]           # (T, DIM)

    attn_bias = bias_ref[...]                                         # (T, T)

    for l in range(DEPTH):
        # -------- pre-norm multi-head self-attention + residual --------
        h = layer_norm(x, ln1_g_ref[l], ln1_b_ref[l])
        qkv = jnp.dot(h, qkv_w_ref[l], preferred_element_type=f32)    # (T, 3*INNER)
        out_w = out_w_ref[l]                                          # (INNER, DIM)

        attn_out = jnp.zeros((TOKENS, DIM), f32)
        for hd in range(HEADS):
            lo = hd * DIM_HEAD
            q = qkv[:, lo:lo + DIM_HEAD]                              # (T, Dh)
            k = qkv[:, INNER + lo:INNER + lo + DIM_HEAD]
            v = qkv[:, 2 * INNER + lo:2 * INNER + lo + DIM_HEAD]

            s = jax.lax.dot_general(q, k, (((1,), (1,)), ((), ())),
                                    preferred_element_type=f32)
            s = s * SCALE + attn_bias                                 # (T, T)
            m = jnp.max(s, axis=-1, keepdims=True)
            p = jnp.exp(s - m)
            inv = pl.reciprocal(jnp.sum(p, axis=-1, keepdims=True), approx=True)
            o = jnp.dot(p * inv, v, preferred_element_type=f32)       # (T, Dh)

            # fold this head's block of the output projection directly in
            attn_out = attn_out + jnp.dot(o, out_w[lo:lo + DIM_HEAD, :],
                                          preferred_element_type=f32)
        x = x + attn_out + out_b_ref[l]

        # -------- pre-norm feed-forward (GELU) + residual --------
        h = layer_norm(x, ln2_g_ref[l], ln2_b_ref[l])
        h = gelu(jnp.dot(h, ff1_w_ref[l], preferred_element_type=f32)
                 + ff1_b_ref[l])
        h = jnp.dot(h, ff2_w_ref[l], preferred_element_type=f32) + ff2_b_ref[l]
        x = x + h

    # -------- final LayerNorm + replaced classification head --------
    x = layer_norm(x, fln_g_ref[...], fln_b_ref[...])
    logits = jnp.dot(x, head_w_ref[...],
                     preferred_element_type=f32) + head_b_ref[...]    # (T, NC)
    for b in range(BATCH):
        logits_ref[b:b + 1, :] = logits[b * SEQ:b * SEQ + 1, :].astype(
            logits_ref.dtype)


# --------------------------- parameters (glue) ---------------------------

def init_params(key):
    keys = iter(jax.random.split(key, 4 + 4 * DEPTH))

    def w_init(k, fan_in, fan_out):
        return (jax.random.normal(k, (fan_in, fan_out), jnp.float32)
                / math.sqrt(fan_in))

    params = {
        "patch_w": w_init(next(keys), PATCH_DIM, DIM),
        "patch_b": jnp.zeros((DIM,), jnp.float32),
        "cls": 0.02 * jax.random.normal(next(keys), (1, 1, DIM), jnp.float32),
        "pos": 0.02 * jax.random.normal(next(keys), (1, SEQ, DIM), jnp.float32),
        "final_ln_g": jnp.ones((DIM,), jnp.float32),
        "final_ln_b": jnp.zeros((DIM,), jnp.float32),
        # replaced head: nn.Linear(hidden_dim, num_classes)
        "head_w": w_init(next(keys), DIM, NUM_CLASSES),
        "head_b": jnp.zeros((NUM_CLASSES,), jnp.float32),
        "layers": [],
    }
    for _ in range(DEPTH):
        params["layers"].append({
            "ln1_g": jnp.ones((DIM,), jnp.float32),
            "ln1_b": jnp.zeros((DIM,), jnp.float32),
            "qkv_w": w_init(next(keys), DIM, 3 * INNER),   # to_qkv: bias=False
            "out_w": w_init(next(keys), INNER, DIM),
            "out_b": jnp.zeros((DIM,), jnp.float32),
            "ln2_g": jnp.ones((DIM,), jnp.float32),
            "ln2_b": jnp.zeros((DIM,), jnp.float32),
            "ff1_w": w_init(next(keys), DIM, MLP_DIM),
            "ff1_b": jnp.zeros((MLP_DIM,), jnp.float32),
            "ff2_w": w_init(next(keys), MLP_DIM, DIM),
            "ff2_b": jnp.zeros((DIM,), jnp.float32),
        })
    return params


# ------------------------------ forward ------------------------------

def moco_vit_classifier_forward(params, img):
    B, C, H, W = img.shape
    assert (B, C, H, W) == (BATCH, CHANNELS, IMAGE, IMAGE)
    p = PATCH
    hh, ww = H // p, W // p

    # ---- plain-JAX layout glue -------------------------------------------
    # 'b c (h p1) (w p2) -> b (h w) (p1 p2 c)'
    patches = img.reshape(B, C, hh, p, ww, p)
    patches = patches.transpose(0, 2, 4, 3, 5, 1).reshape(B, N_PATCHES, PATCH_DIM)
    # zero "patch" row per image for the cls slot -> one lane-dense token slab
    patches_tok = jnp.concatenate(
        [jnp.zeros((B, 1, PATCH_DIM), img.dtype), patches], axis=1
    ).reshape(TOKENS, PATCH_DIM)

    # additive per-token base: cls slot = cls + pos[0]; patch slots = pos[i] + patch_b
    pos = params["pos"][0]                                            # (S, DIM)
    base = jnp.concatenate(
        [params["cls"].reshape(1, DIM) + pos[:1],
         pos[1:] + params["patch_b"].reshape(1, DIM)], axis=0)        # (S, DIM)
    base_tok = jnp.tile(base, (BATCH, 1))                             # (T, DIM)

    # block-diagonal attention bias: tokens attend only within their own image
    img_id = jnp.arange(TOKENS, dtype=jnp.int32) // SEQ
    attn_bias = jnp.where(img_id[:, None] == img_id[None, :],
                          0.0, -1e30).astype(jnp.float32)             # (T, T)

    def stack(name, shp):
        return jnp.stack([layer[name].reshape(shp)
                          for layer in params["layers"]], axis=0)

    ln1_g = stack("ln1_g", (1, DIM)); ln1_b = stack("ln1_b", (1, DIM))
    qkv_w = stack("qkv_w", (DIM, 3 * INNER))
    out_w = stack("out_w", (INNER, DIM)); out_b = stack("out_b", (1, DIM))
    ln2_g = stack("ln2_g", (1, DIM)); ln2_b = stack("ln2_b", (1, DIM))
    ff1_w = stack("ff1_w", (DIM, MLP_DIM)); ff1_b = stack("ff1_b", (1, MLP_DIM))
    ff2_w = stack("ff2_w", (MLP_DIM, DIM)); ff2_b = stack("ff2_b", (1, DIM))

    # single fused kernel: everything (weights + activations) VMEM-resident,
    # single invocation, only HBM write is the (B, NUM_CLASSES) logits.
    return pl.pallas_call(
        _fused_vit_kernel,
        out_shape=jax.ShapeDtypeStruct((BATCH, NUM_CLASSES), jnp.float32),
    )(patches_tok, base_tok, attn_bias, params["patch_w"],
      ln1_g, ln1_b, qkv_w, out_w, out_b, ln2_g, ln2_b,
      ff1_w, ff1_b, ff2_w, ff2_b,
      params["final_ln_g"].reshape(1, DIM),
      params["final_ln_b"].reshape(1, DIM),
      params["head_w"], params["head_b"].reshape(1, NUM_CLASSES))


if __name__ == "__main__":
    key = jax.random.PRNGKey(0)
    pkey, xkey = jax.random.split(key)
    params = init_params(pkey)
    x = jax.random.normal(xkey, (BATCH, CHANNELS, IMAGE, IMAGE), jnp.float32)

    fwd = jax.jit(moco_vit_classifier_forward)
    logits = fwd(params, x)
    jax.block_until_ready(logits)
    assert logits.shape == (BATCH, NUM_CLASSES)
    assert bool(jnp.all(jnp.isfinite(logits)))
    print("KERNEL_OK")
</pallas_src>

<mosaic_0001>
module attributes {stable_mosaic.version = 11 : i64} {
  func.func @_fused_vit_kernel(%arg0: memref<10x192xf32, #tpu.memory_space<vmem>>, %arg1: memref<10x32xf32, #tpu.memory_space<vmem>>, %arg2: memref<10x10xf32, #tpu.memory_space<vmem>>, %arg3: memref<192x32xf32, #tpu.memory_space<vmem>>, %arg4: memref<2x1x32xf32, #tpu.memory_space<vmem>>, %arg5: memref<2x1x32xf32, #tpu.memory_space<vmem>>, %arg6: memref<2x32x96xf32, #tpu.memory_space<vmem>>, %arg7: memref<2x32x32xf32, #tpu.memory_space<vmem>>, %arg8: memref<2x1x32xf32, #tpu.memory_space<vmem>>, %arg9: memref<2x1x32xf32, #tpu.memory_space<vmem>>, %arg10: memref<2x1x32xf32, #tpu.memory_space<vmem>>, %arg11: memref<2x32x64xf32, #tpu.memory_space<vmem>>, %arg12: memref<2x1x64xf32, #tpu.memory_space<vmem>>, %arg13: memref<2x64x32xf32, #tpu.memory_space<vmem>>, %arg14: memref<2x1x32xf32, #tpu.memory_space<vmem>>, %arg15: memref<1x32xf32, #tpu.memory_space<vmem>>, %arg16: memref<1x32xf32, #tpu.memory_space<vmem>>, %arg17: memref<32x10xf32, #tpu.memory_space<vmem>>, %arg18: memref<1x10xf32, #tpu.memory_space<vmem>>, %arg19: memref<2x10xf32, #tpu.memory_space<vmem>>) attributes {dimension_semantics = [], scalar_prefetch = 0 : i64, scratch_operands = 0 : i64, tpu.core_type = #tpu.core_type<tc>} {
    %c0 = arith.constant 0 : index
    %c0_0 = arith.constant 0 : index
    %0 = vector.load %arg0[%c0, %c0_0] : memref<10x192xf32, #tpu.memory_space<vmem>>, vector<10x192xf32>
    %c0_1 = arith.constant 0 : index
    %c0_2 = arith.constant 0 : index
    %1 = vector.load %arg3[%c0_1, %c0_2] : memref<192x32xf32, #tpu.memory_space<vmem>>, vector<192x32xf32>
    %cst = arith.constant dense<0.000000e+00> : vector<10x32xf32>
    %2 = tpu.matmul %0, %1, %cst {dimension_numbers = #tpu.dot_dimension_numbers<[1], [0], [0], [1], [0, 0, 1, 1], [], []>} : vector<10x192xf32>, vector<192x32xf32>, vector<10x32xf32> -> vector<10x32xf32>
    %c0_3 = arith.constant 0 : index
    %c0_4 = arith.constant 0 : index
    %3 = vector.load %arg1[%c0_3, %c0_4] : memref<10x32xf32, #tpu.memory_space<vmem>>, vector<10x32xf32>
    %4 = arith.addf %2, %3 : vector<10x32xf32>
    %c0_5 = arith.constant 0 : index
    %c0_6 = arith.constant 0 : index
    %5 = vector.load %arg2[%c0_5, %c0_6] : memref<10x10xf32, #tpu.memory_space<vmem>>, vector<10x10xf32>
    %c0_7 = arith.constant 0 : index
    %c0_8 = arith.constant 0 : index
    %c0_9 = arith.constant 0 : index
    %6 = vector.load %arg4[%c0_7, %c0_8, %c0_9] : memref<2x1x32xf32, #tpu.memory_space<vmem>>, vector<1x1x32xf32>
    %7 = vector.shape_cast %6 : vector<1x1x32xf32> to vector<1x32xf32>
    %c0_10 = arith.constant 0 : index
    %c0_11 = arith.constant 0 : index
    %c0_12 = arith.constant 0 : index
    %8 = vector.load %arg5[%c0_10, %c0_11, %c0_12] : memref<2x1x32xf32, #tpu.memory_space<vmem>>, vector<1x1x32xf32>
    %9 = vector.shape_cast %8 : vector<1x1x32xf32> to vector<1x32xf32>
    %cst_13 = arith.constant dense<0.000000e+00> : vector<10xf32>
    %10 = vector.multi_reduction <add>, %4, %cst_13 [1] : vector<10x32xf32> to vector<10xf32>
    %11 = vector.shape_cast %10 : vector<10xf32> to vector<10x1xf32>
    %cst_14 = arith.constant 3.200000e+01 : f32
    %12 = vector.broadcast %cst_14 : f32 to vector<10x1xf32>
    %13 = arith.divf %11, %12 : vector<10x1xf32>
    %14 = vector.broadcast %13 : vector<10x1xf32> to vector<10x32xf32>
    %15 = arith.subf %4, %14 : vector<10x32xf32>
    %16 = arith.mulf %15, %15 : vector<10x32xf32>
    %cst_15 = arith.constant dense<0.000000e+00> : vector<10xf32>
    %17 = vector.multi_reduction <add>, %16, %cst_15 [1] : vector<10x32xf32> to vector<10xf32>
    %18 = vector.shape_cast %17 : vector<10xf32> to vector<10x1xf32>
    %cst_16 = arith.constant 3.200000e+01 : f32
    %19 = vector.broadcast %cst_16 : f32 to vector<10x1xf32>
    %20 = arith.divf %18, %19 : vector<10x1xf32>
    %cst_17 = arith.constant 9.99999974E-6 : f32
    %21 = vector.broadcast %cst_17 : f32 to vector<10x1xf32>
    %22 = arith.addf %20, %21 : vector<10x1xf32>
    %23 = math.rsqrt %22 : vector<10x1xf32>
    %24 = vector.broadcast %23 : vector<10x1xf32> to vector<10x32xf32>
    %25 = arith.mulf %15, %24 : vector<10x32xf32>
    %26 = vector.broadcast %7 : vector<1x32xf32> to vector<10x32xf32>
    %27 = arith.mulf %25, %26 : vector<10x32xf32>
    %28 = vector.broadcast %9 : vector<1x32xf32> to vector<10x32xf32>
    %29 = arith.addf %27, %28 : vector<10x32xf32>
    %c0_18 = arith.constant 0 : index
    %c0_19 = arith.constant 0 : index
    %c0_20 = arith.constant 0 : index
    %30 = vector.load %arg6[%c0_18, %c0_19, %c0_20] : memref<2x32x96xf32, #tpu.memory_space<vmem>>, vector<1x32x96xf32>
    %31 = vector.shape_cast %30 : vector<1x32x96xf32> to vector<32x96xf32>
    %cst_21 = arith.constant dense<0.000000e+00> : vector<10x96xf32>
    %32 = tpu.matmul %29, %31, %cst_21 {dimension_numbers = #tpu.dot_dimension_numbers<[1], [0], [0], [1], [0, 0, 1, 1], [], []>} : vector<10x32xf32>, vector<32x96xf32>, vector<10x96xf32> -> vector<10x96xf32>
    %c0_22 = arith.constant 0 : index
    %c0_23 = arith.constant 0 : index
    %c0_24 = arith.constant 0 : index
    %33 = vector.load %arg7[%c0_22, %c0_23, %c0_24] : memref<2x32x32xf32, #tpu.memory_space<vmem>>, vector<1x32x32xf32>
    %34 = vector.shape_cast %33 : vector<1x32x32xf32> to vector<32x32xf32>
    %cst_25 = arith.constant 0.000000e+00 : f32
    %35 = vector.broadcast %cst_25 : f32 to vector<10x32xf32>
    %36 = vector.extract_strided_slice %32 {offsets = [0, 0], sizes = [10, 8], strides = [1, 1]} : vector<10x96xf32> to vector<10x8xf32>
    %37 = vector.extract_strided_slice %32 {offsets = [0, 32], sizes = [10, 8], strides = [1, 1]} : vector<10x96xf32> to vector<10x8xf32>
    %38 = vector.extract_strided_slice %32 {offsets = [0, 64], sizes = [10, 8], strides = [1, 1]} : vector<10x96xf32> to vector<10x8xf32>
    %cst_26 = arith.constant dense<0.000000e+00> : vector<10x10xf32>
    %39 = tpu.matmul %36, %37, %cst_26 {dimension_numbers = #tpu.dot_dimension_numbers<[1], [1], [0], [0], [0, 0, 1, 0], [], []>} : vector<10x8xf32>, vector<10x8xf32>, vector<10x10xf32> -> vector<10x10xf32>
    %cst_27 = arith.constant 0.353553385 : f32
    %40 = vector.broadcast %cst_27 : f32 to vector<10x10xf32>
    %41 = arith.mulf %39, %40 : vector<10x10xf32>
    %42 = arith.addf %41, %5 : vector<10x10xf32>
    %cst_28 = arith.constant dense<0xFF800000> : vector<10xf32>
    %43 = vector.multi_reduction <maximumf>, %42, %cst_28 [1] : vector<10x10xf32> to vector<10xf32>
    %44 = vector.shape_cast %43 : vector<10xf32> to vector<10x1xf32>
    %45 = vector.broadcast %44 : vector<10x1xf32> to vector<10x10xf32>
    %46 = arith.subf %42, %45 : vector<10x10xf32>
    %47 = math.exp %46 : vector<10x10xf32>
    %cst_29 = arith.constant dense<0.000000e+00> : vector<10xf32>
    %48 = vector.multi_reduction <add>, %47, %cst_29 [1] : vector<10x10xf32> to vector<10xf32>
    %49 = vector.shape_cast %48 : vector<10xf32> to vector<10x1xf32>
    %50 = tpu.reciprocal %49 {approx = true} : vector<10x1xf32> -> vector<10x1xf32>
    %51 = vector.broadcast %50 : vector<10x1xf32> to vector<10x10xf32>
    %52 = arith.mulf %47, %51 : vector<10x10xf32>
    %cst_30 = arith.constant dense<0.000000e+00> : vector<10x8xf32>
    %53 = tpu.matmul %52, %38, %cst_30 {dimension_numbers = #tpu.dot_dimension_numbers<[1], [0], [0], [1], [0, 0, 1, 1], [], []>} : vector<10x10xf32>, vector<10x8xf32>, vector<10x8xf32> -> vector<10x8xf32>
    %54 = vector.extract_strided_slice %34 {offsets = [0, 0], sizes = [8, 32], strides = [1, 1]} : vector<32x32xf32> to vector<8x32xf32>
    %cst_31 = arith.constant dense<0.000000e+00> : vector<10x32xf32>
    %55 = tpu.matmul %53, %54, %cst_31 {dimension_numbers = #tpu.dot_dimension_numbers<[1], [0], [0], [1], [0, 0, 1, 1], [], []>} : vector<10x8xf32>, vector<8x32xf32>, vector<10x32xf32> -> vector<10x32xf32>
    %56 = arith.addf %35, %55 : vector<10x32xf32>
    %57 = vector.extract_strided_slice %32 {offsets = [0, 8], sizes = [10, 8], strides = [1, 1]} : vector<10x96xf32> to vector<10x8xf32>
    %58 = vector.extract_strided_slice %32 {offsets = [0, 40], sizes = [10, 8], strides = [1, 1]} : vector<10x96xf32> to vector<10x8xf32>
    %59 = vector.extract_strided_slice %32 {offsets = [0, 72], sizes = [10, 8], strides = [1, 1]} : vector<10x96xf32> to vector<10x8xf32>
    %cst_32 = arith.constant dense<0.000000e+00> : vector<10x10xf32>
    %60 = tpu.matmul %57, %58, %cst_32 {dimension_numbers = #tpu.dot_dimension_numbers<[1], [1], [0], [0], [0, 0, 1, 0], [], []>} : vector<10x8xf32>, vector<10x8xf32>, vector<10x10xf32> -> vector<10x10xf32>
    %cst_33 = arith.constant 0.353553385 : f32
    %61 = vector.broadcast %cst_33 : f32 to vector<10x10xf32>
    %62 = arith.mulf %60, %61 : vector<10x10xf32>
    %63 = arith.addf %62, %5 : vector<10x10xf32>
    %cst_34 = arith.constant dense<0xFF800000> : vector<10xf32>
    %64 = vector.multi_reduction <maximumf>, %63, %cst_34 [1] : vector<10x10xf32> to vector<10xf32>
    %65 = vector.shape_cast %64 : vector<10xf32> to vector<10x1xf32>
    %66 = vector.broadcast %65 : vector<10x1xf32> to vector<10x10xf32>
    %67 = arith.subf %63, %66 : vector<10x10xf32>
    %68 = math.exp %67 : vector<10x10xf32>
    %cst_35 = arith.constant dense<0.000000e+00> : vector<10xf32>
    %69 = vector.multi_reduction <add>, %68, %cst_35 [1] : vector<10x10xf32> to vector<10xf32>
    %70 = vector.shape_cast %69 : vector<10xf32> to vector<10x1xf32>
    %71 = tpu.reciprocal %70 {approx = true} : vector<10x1xf32> -> vector<10x1xf32>
    %72 = vector.broadcast %71 : vector<10x1xf32> to vector<10x10xf32>
    %73 = arith.mulf %68, %72 : vector<10x10xf32>
    %cst_36 = arith.constant dense<0.000000e+00> : vector<10x8xf32>
    %74 = tpu.matmul %73, %59, %cst_36 {dimension_numbers = #tpu.dot_dimension_numbers<[1], [0], [0], [1], [0, 0, 1, 1], [], []>} : vector<10x10xf32>, vector<10x8xf32>, vector<10x8xf32> -> vector<10x8xf32>
    %75 = vector.extract_strided_slice %34 {offsets = [8, 0], sizes = [8, 32], strides = [1, 1]} : vector<32x32xf32> to vector<8x32xf32>
    %cst_37 = arith.constant dense<0.000000e+00> : vector<10x32xf32>
    %76 = tpu.matmul %74, %75, %cst_37 {dimension_numbers = #tpu.dot_dimension_numbers<[1], [0], [0], [1], [0, 0, 1, 1], [], []>} : vector<10x8xf32>, vector<8x32xf32>, vector<10x32xf32> -> vector<10x32xf32>
    %77 = arith.addf %56, %76 : vector<10x32xf32>
    %78 = vector.extract_strided_slice %32 {offsets = [0, 16], sizes = [10, 8], strides = [1, 1]} : vector<10x96xf32> to vector<10x8xf32>
    %79 = vector.extract_strided_slice %32 {offsets = [0, 48], sizes = [10, 8], strides = [1, 1]} : vector<10x96xf32> to vector<10x8xf32>
    %80 = vector.extract_strided_slice %32 {offsets = [0, 80], sizes = [10, 8], strides = [1, 1]} : vector<10x96xf32> to vector<10x8xf32>
    %cst_38 = arith.constant dense<0.000000e+00> : vector<10x10xf32>
    %81 = tpu.matmul %78, %79, %cst_38 {dimension_numbers = #tpu.dot_dimension_numbers<[1], [1], [0], [0], [0, 0, 1, 0], [], []>} : vector<10x8xf32>, vector<10x8xf32>, vector<10x10xf32> -> vector<10x10xf32>
    %cst_39 = arith.constant 0.353553385 : f32
    %82 = vector.broadcast %cst_39 : f32 to vector<10x10xf32>
    %83 = arith.mulf %81, %82 : vector<10x10xf32>
    %84 = arith.addf %83, %5 : vector<10x10xf32>
    %cst_40 = arith.constant dense<0xFF800000> : vector<10xf32>
    %85 = vector.multi_reduction <maximumf>, %84, %cst_40 [1] : vector<10x10xf32> to vector<10xf32>
    %86 = vector.shape_cast %85 : vector<10xf32> to vector<10x1xf32>
    %87 = vector.broadcast %86 : vector<10x1xf32> to vector<10x10xf32>
    %88 = arith.subf %84, %87 : vector<10x10xf32>
    %89 = math.exp %88 : vector<10x10xf32>
    %cst_41 = arith.constant dense<0.000000e+00> : vector<10xf32>
    %90 = vector.multi_reduction <add>, %89, %cst_41 [1] : vector<10x10xf32> to vector<10xf32>
    %91 = vector.shape_cast %90 : vector<10xf32> to vector<10x1xf32>
    %92 = tpu.reciprocal %91 {approx = true} : vector<10x1xf32> -> vector<10x1xf32>
    %93 = vector.broadcast %92 : vector<10x1xf32> to vector<10x10xf32>
    %94 = arith.mulf %89, %93 : vector<10x10xf32>
    %cst_42 = arith.constant dense<0.000000e+00> : vector<10x8xf32>
    %95 = tpu.matmul %94, %80, %cst_42 {dimension_numbers = #tpu.dot_dimension_numbers<[1], [0], [0], [1], [0, 0, 1, 1], [], []>} : vector<10x10xf32>, vector<10x8xf32>, vector<10x8xf32> -> vector<10x8xf32>
    %96 = vector.extract_strided_slice %34 {offsets = [16, 0], sizes = [8, 32], strides = [1, 1]} : vector<32x32xf32> to vector<8x32xf32>
    %cst_43 = arith.constant dense<0.000000e+00> : vector<10x32xf32>
    %97 = tpu.matmul %95, %96, %cst_43 {dimension_numbers = #tpu.dot_dimension_numbers<[1], [0], [0], [1], [0, 0, 1, 1], [], []>} : vector<10x8xf32>, vector<8x32xf32>, vector<10x32xf32> -> vector<10x32xf32>
    %98 = arith.addf %77, %97 : vector<10x32xf32>
    %99 = vector.extract_strided_slice %32 {offsets = [0, 24], sizes = [10, 8], strides = [1, 1]} : vector<10x96xf32> to vector<10x8xf32>
    %100 = vector.extract_strided_slice %32 {offsets = [0, 56], sizes = [10, 8], strides = [1, 1]} : vector<10x96xf32> to vector<10x8xf32>
    %101 = vector.extract_strided_slice %32 {offsets = [0, 88], sizes = [10, 8], strides = [1, 1]} : vector<10x96xf32> to vector<10x8xf32>
    %cst_44 = arith.constant dense<0.000000e+00> : vector<10x10xf32>
    %102 = tpu.matmul %99, %100, %cst_44 {dimension_numbers = #tpu.dot_dimension_numbers<[1], [1], [0], [0], [0, 0, 1, 0], [], []>} : vector<10x8xf32>, vector<10x8xf32>, vector<10x10xf32> -> vector<10x10xf32>
    %cst_45 = arith.constant 0.353553385 : f32
    %103 = vector.broadcast %cst_45 : f32 to vector<10x10xf32>
    %104 = arith.mulf %102, %103 : vector<10x10xf32>
    %105 = arith.addf %104, %5 : vector<10x10xf32>
    %cst_46 = arith.constant dense<0xFF800000> : vector<10xf32>
    %106 = vector.multi_reduction <maximumf>, %105, %cst_46 [1] : vector<10x10xf32> to vector<10xf32>
    %107 = vector.shape_cast %106 : vector<10xf32> to vector<10x1xf32>
    %108 = vector.broadcast %107 : vector<10x1xf32> to vector<10x10xf32>
    %109 = arith.subf %105, %108 : vector<10x10xf32>
    %110 = math.exp %109 : vector<10x10xf32>
    %cst_47 = arith.constant dense<0.000000e+00> : vector<10xf32>
    %111 = vector.multi_reduction <add>, %110, %cst_47 [1] : vector<10x10xf32> to vector<10xf32>
    %112 = vector.shape_cast %111 : vector<10xf32> to vector<10x1xf32>
    %113 = tpu.reciprocal %112 {approx = true} : vector<10x1xf32> -> vector<10x1xf32>
    %114 = vector.broadcast %113 : vector<10x1xf32> to vector<10x10xf32>
    %115 = arith.mulf %110, %114 : vector<10x10xf32>
    %cst_48 = arith.constant dense<0.000000e+00> : vector<10x8xf32>
    %116 = tpu.matmul %115, %101, %cst_48 {dimension_numbers = #tpu.dot_dimension_numbers<[1], [0], [0], [1], [0, 0, 1, 1], [], []>} : vector<10x10xf32>, vector<10x8xf32>, vector<10x8xf32> -> vector<10x8xf32>
    %117 = vector.extract_strided_slice %34 {offsets = [24, 0], sizes = [8, 32], strides = [1, 1]} : vector<32x32xf32> to vector<8x32xf32>
    %cst_49 = arith.constant dense<0.000000e+00> : vector<10x32xf32>
    %118 = tpu.matmul %116, %117, %cst_49 {dimension_numbers = #tpu.dot_dimension_numbers<[1], [0], [0], [1], [0, 0, 1, 1], [], []>} : vector<10x8xf32>, vector<8x32xf32>, vector<10x32xf32> -> vector<10x32xf32>
    %119 = arith.addf %98, %118 : vector<10x32xf32>
    %120 = arith.addf %4, %119 : vector<10x32xf32>
    %c0_50 = arith.constant 0 : index
    %c0_51 = arith.constant 0 : index
    %c0_52 = arith.constant 0 : index
    %121 = vector.load %arg8[%c0_50, %c0_51, %c0_52] : memref<2x1x32xf32, #tpu.memory_space<vmem>>, vector<1x1x32xf32>
    %122 = vector.shape_cast %121 : vector<1x1x32xf32> to vector<1x32xf32>
    %123 = vector.broadcast %122 : vector<1x32xf32> to vector<10x32xf32>
    %124 = arith.addf %120, %123 : vector<10x32xf32>
    %c0_53 = arith.constant 0 : index
    %c0_54 = arith.constant 0 : index
    %c0_55 = arith.constant 0 : index
    %125 = vector.load %arg9[%c0_53, %c0_54, %c0_55] : memref<2x1x32xf32, #tpu.memory_space<vmem>>, vector<1x1x32xf32>
    %126 = vector.shape_cast %125 : vector<1x1x32xf32> to vector<1x32xf32>
    %c0_56 = arith.constant 0 : index
    %c0_57 = arith.constant 0 : index
    %c0_58 = arith.constant 0 : index
    %127 = vector.load %arg10[%c0_56, %c0_57, %c0_58] : memref<2x1x32xf32, #tpu.memory_space<vmem>>, vector<1x1x32xf32>
    %128 = vector.shape_cast %127 : vector<1x1x32xf32> to vector<1x32xf32>
    %cst_59 = arith.constant dense<0.000000e+00> : vector<10xf32>
    %129 = vector.multi_reduction <add>, %124, %cst_59 [1] : vector<10x32xf32> to vector<10xf32>
    %130 = vector.shape_cast %129 : vector<10xf32> to vector<10x1xf32>
    %cst_60 = arith.constant 3.200000e+01 : f32
    %131 = vector.broadcast %cst_60 : f32 to vector<10x1xf32>
    %132 = arith.divf %130, %131 : vector<10x1xf32>
    %133 = vector.broadcast %132 : vector<10x1xf32> to vector<10x32xf32>
    %134 = arith.subf %124, %133 : vector<10x32xf32>
    %135 = arith.mulf %134, %134 : vector<10x32xf32>
    %cst_61 = arith.constant dense<0.000000e+00> : vector<10xf32>
    %136 = vector.multi_reduction <add>, %135, %cst_61 [1] : vector<10x32xf32> to vector<10xf32>
    %137 = vector.shape_cast %136 : vector<10xf32> to vector<10x1xf32>
    %cst_62 = arith.constant 3.200000e+01 : f32
    %138 = vector.broadcast %cst_62 : f32 to vector<10x1xf32>
    %139 = arith.divf %137, %138 : vector<10x1xf32>
    %cst_63 = arith.constant 9.99999974E-6 : f32
    %140 = vector.broadcast %cst_63 : f32 to vector<10x1xf32>
    %141 = arith.addf %139, %140 : vector<10x1xf32>
    %142 = math.rsqrt %141 : vector<10x1xf32>
    %143 = vector.broadcast %142 : vector<10x1xf32> to vector<10x32xf32>
    %144 = arith.mulf %134, %143 : vector<10x32xf32>
    %145 = vector.broadcast %126 : vector<1x32xf32> to vector<10x32xf32>
    %146 = arith.mulf %144, %145 : vector<10x32xf32>
    %147 = vector.broadcast %128 : vector<1x32xf32> to vector<10x32xf32>
    %148 = arith.addf %146, %147 : vector<10x32xf32>
    %c0_64 = arith.constant 0 : index
    %c0_65 = arith.constant 0 : index
    %c0_66 = arith.constant 0 : index
    %149 = vector.load %arg11[%c0_64, %c0_65, %c0_66] : memref<2x32x64xf32, #tpu.memory_space<vmem>>, vector<1x32x64xf32>
    %150 = vector.shape_cast %149 : vector<1x32x64xf32> to vector<32x64xf32>
    %cst_67 = arith.constant dense<0.000000e+00> : vector<10x64xf32>
    %151 = tpu.matmul %148, %150, %cst_67 {dimension_numbers = #tpu.dot_dimension_numbers<[1], [0], [0], [1], [0, 0, 1, 1], [], []>} : vector<10x32xf32>, vector<32x64xf32>, vector<10x64xf32> -> vector<10x64xf32>
    %c0_68 = arith.constant 0 : index
    %c0_69 = arith.constant 0 : index
    %c0_70 = arith.constant 0 : index
    %152 = vector.load %arg12[%c0_68, %c0_69, %c0_70] : memref<2x1x64xf32, #tpu.memory_space<vmem>>, vector<1x1x64xf32>
    %153 = vector.shape_cast %152 : vector<1x1x64xf32> to vector<1x64xf32>
    %154 = vector.broadcast %153 : vector<1x64xf32> to vector<10x64xf32>
    %155 = arith.addf %151, %154 : vector<10x64xf32>
    %cst_71 = arith.constant 4.471500e-02 : f32
    %156 = vector.broadcast %cst_71 : f32 to vector<10x64xf32>
    %157 = arith.mulf %156, %155 : vector<10x64xf32>
    %158 = arith.mulf %157, %155 : vector<10x64xf32>
    %159 = arith.mulf %158, %155 : vector<10x64xf32>
    %160 = arith.addf %155, %159 : vector<10x64xf32>
    %cst_72 = arith.constant 0.797884583 : f32
    %161 = vector.broadcast %cst_72 : f32 to vector<10x64xf32>
    %162 = arith.mulf %161, %160 : vector<10x64xf32>
    %cst_73 = arith.constant 5.000000e-01 : f32
    %163 = vector.broadcast %cst_73 : f32 to vector<10x64xf32>
    %164 = arith.mulf %163, %155 : vector<10x64xf32>
    %165 = math.tanh %162 : vector<10x64xf32>
    %cst_74 = arith.constant 1.000000e+00 : f32
    %166 = vector.broadcast %cst_74 : f32 to vector<10x64xf32>
    %167 = arith.addf %166, %165 : vector<10x64xf32>
    %168 = arith.mulf %164, %167 : vector<10x64xf32>
    %c0_75 = arith.constant 0 : index
    %c0_76 = arith.constant 0 : index
    %c0_77 = arith.constant 0 : index
    %169 = vector.load %arg13[%c0_75, %c0_76, %c0_77] : memref<2x64x32xf32, #tpu.memory_space<vmem>>, vector<1x64x32xf32>
    %170 = vector.shape_cast %169 : vector<1x64x32xf32> to vector<64x32xf32>
    %cst_78 = arith.constant dense<0.000000e+00> : vector<10x32xf32>
    %171 = tpu.matmul %168, %170, %cst_78 {dimension_numbers = #tpu.dot_dimension_numbers<[1], [0], [0], [1], [0, 0, 1, 1], [], []>} : vector<10x64xf32>, vector<64x32xf32>, vector<10x32xf32> -> vector<10x32xf32>
    %c0_79 = arith.constant 0 : index
    %c0_80 = arith.constant 0 : index
    %c0_81 = arith.constant 0 : index
    %172 = vector.load %arg14[%c0_79, %c0_80, %c0_81] : memref<2x1x32xf32, #tpu.memory_space<vmem>>, vector<1x1x32xf32>
    %173 = vector.shape_cast %172 : vector<1x1x32xf32> to vector<1x32xf32>
    %174 = vector.broadcast %173 : vector<1x32xf32> to vector<10x32xf32>
    %175 = arith.addf %171, %174 : vector<10x32xf32>
    %176 = arith.addf %124, %175 : vector<10x32xf32>
    %c1 = arith.constant 1 : index
    %c0_82 = arith.constant 0 : index
    %c0_83 = arith.constant 0 : index
    %177 = vector.load %arg4[%c1, %c0_82, %c0_83] : memref<2x1x32xf32, #tpu.memory_space<vmem>>, vector<1x1x32xf32>
    %178 = vector.shape_cast %177 : vector<1x1x32xf32> to vector<1x32xf32>
    %c1_84 = arith.constant 1 : index
    %c0_85 = arith.constant 0 : index
    %c0_86 = arith.constant 0 : index
    %179 = vector.load %arg5[%c1_84, %c0_85, %c0_86] : memref<2x1x32xf32, #tpu.memory_space<vmem>>, vector<1x1x32xf32>
    %180 = vector.shape_cast %179 : vector<1x1x32xf32> to vector<1x32xf32>
    %cst_87 = arith.constant dense<0.000000e+00> : vector<10xf32>
    %181 = vector.multi_reduction <add>, %176, %cst_87 [1] : vector<10x32xf32> to vector<10xf32>
    %182 = vector.shape_cast %181 : vector<10xf32> to vector<10x1xf32>
    %cst_88 = arith.constant 3.200000e+01 : f32
    %183 = vector.broadcast %cst_88 : f32 to vector<10x1xf32>
    %184 = arith.divf %182, %183 : vector<10x1xf32>
    %185 = vector.broadcast %184 : vector<10x1xf32> to vector<10x32xf32>
    %186 = arith.subf %176, %185 : vector<10x32xf32>
    %187 = arith.mulf %186, %186 : vector<10x32xf32>
    %cst_89 = arith.constant dense<0.000000e+00> : vector<10xf32>
    %188 = vector.multi_reduction <add>, %187, %cst_89 [1] : vector<10x32xf32> to vector<10xf32>
    %189 = vector.shape_cast %188 : vector<10xf32> to vector<10x1xf32>
    %cst_90 = arith.constant 3.200000e+01 : f32
    %190 = vector.broadcast %cst_90 : f32 to vector<10x1xf32>
    %191 = arith.divf %189, %190 : vector<10x1xf32>
    %cst_91 = arith.constant 9.99999974E-6 : f32
    %192 = vector.broadcast %cst_91 : f32 to vector<10x1xf32>
    %193 = arith.addf %191, %192 : vector<10x1xf32>
    %194 = math.rsqrt %193 : vector<10x1xf32>
    %195 = vector.broadcast %194 : vector<10x1xf32> to vector<10x32xf32>
    %196 = arith.mulf %186, %195 : vector<10x32xf32>
    %197 = vector.broadcast %178 : vector<1x32xf32> to vector<10x32xf32>
    %198 = arith.mulf %196, %197 : vector<10x32xf32>
    %199 = vector.broadcast %180 : vector<1x32xf32> to vector<10x32xf32>
    %200 = arith.addf %198, %199 : vector<10x32xf32>
    %c1_92 = arith.constant 1 : index
    %c0_93 = arith.constant 0 : index
    %c0_94 = arith.constant 0 : index
    %201 = vector.load %arg6[%c1_92, %c0_93, %c0_94] : memref<2x32x96xf32, #tpu.memory_space<vmem>>, vector<1x32x96xf32>
    %202 = vector.shape_cast %201 : vector<1x32x96xf32> to vector<32x96xf32>
    %cst_95 = arith.constant dense<0.000000e+00> : vector<10x96xf32>
    %203 = tpu.matmul %200, %202, %cst_95 {dimension_numbers = #tpu.dot_dimension_numbers<[1], [0], [0], [1], [0, 0, 1, 1], [], []>} : vector<10x32xf32>, vector<32x96xf32>, vector<10x96xf32> -> vector<10x96xf32>
    %c1_96 = arith.constant 1 : index
    %c0_97 = arith.constant 0 : index
    %c0_98 = arith.constant 0 : index
    %204 = vector.load %arg7[%c1_96, %c0_97, %c0_98] : memref<2x32x32xf32, #tpu.memory_space<vmem>>, vector<1x32x32xf32>
    %205 = vector.shape_cast %204 : vector<1x32x32xf32> to vector<32x32xf32>
    %cst_99 = arith.constant 0.000000e+00 : f32
    %206 = vector.broadcast %cst_99 : f32 to vector<10x32xf32>
    %207 = vector.extract_strided_slice %203 {offsets = [0, 0], sizes = [10, 8], strides = [1, 1]} : vector<10x96xf32> to vector<10x8xf32>
    %208 = vector.extract_strided_slice %203 {offsets = [0, 32], sizes = [10, 8], strides = [1, 1]} : vector<10x96xf32> to vector<10x8xf32>
    %209 = vector.extract_strided_slice %203 {offsets = [0, 64], sizes = [10, 8], strides = [1, 1]} : vector<10x96xf32> to vector<10x8xf32>
    %cst_100 = arith.constant dense<0.000000e+00> : vector<10x10xf32>
    %210 = tpu.matmul %207, %208, %cst_100 {dimension_numbers = #tpu.dot_dimension_numbers<[1], [1], [0], [0], [0, 0, 1, 0], [], []>} : vector<10x8xf32>, vector<10x8xf32>, vector<10x10xf32> -> vector<10x10xf32>
    %cst_101 = arith.constant 0.353553385 : f32
    %211 = vector.broadcast %cst_101 : f32 to vector<10x10xf32>
    %212 = arith.mulf %210, %211 : vector<10x10xf32>
    %213 = arith.addf %212, %5 : vector<10x10xf32>
    %cst_102 = arith.constant dense<0xFF800000> : vector<10xf32>
    %214 = vector.multi_reduction <maximumf>, %213, %cst_102 [1] : vector<10x10xf32> to vector<10xf32>
    %215 = vector.shape_cast %214 : vector<10xf32> to vector<10x1xf32>
    %216 = vector.broadcast %215 : vector<10x1xf32> to vector<10x10xf32>
    %217 = arith.subf %213, %216 : vector<10x10xf32>
    %218 = math.exp %217 : vector<10x10xf32>
    %cst_103 = arith.constant dense<0.000000e+00> : vector<10xf32>
    %219 = vector.multi_reduction <add>, %218, %cst_103 [1] : vector<10x10xf32> to vector<10xf32>
    %220 = vector.shape_cast %219 : vector<10xf32> to vector<10x1xf32>
    %221 = tpu.reciprocal %220 {approx = true} : vector<10x1xf32> -> vector<10x1xf32>
    %222 = vector.broadcast %221 : vector<10x1xf32> to vector<10x10xf32>
    %223 = arith.mulf %218, %222 : vector<10x10xf32>
    %cst_104 = arith.constant dense<0.000000e+00> : vector<10x8xf32>
    %224 = tpu.matmul %223, %209, %cst_104 {dimension_numbers = #tpu.dot_dimension_numbers<[1], [0], [0], [1], [0, 0, 1, 1], [], []>} : vector<10x10xf32>, vector<10x8xf32>, vector<10x8xf32> -> vector<10x8xf32>
    %225 = vector.extract_strided_slice %205 {offsets = [0, 0], sizes = [8, 32], strides = [1, 1]} : vector<32x32xf32> to vector<8x32xf32>
    %cst_105 = arith.constant dense<0.000000e+00> : vector<10x32xf32>
    %226 = tpu.matmul %224, %225, %cst_105 {dimension_numbers = #tpu.dot_dimension_numbers<[1], [0], [0], [1], [0, 0, 1, 1], [], []>} : vector<10x8xf32>, vector<8x32xf32>, vector<10x32xf32> -> vector<10x32xf32>
    %227 = arith.addf %206, %226 : vector<10x32xf32>
    %228 = vector.extract_strided_slice %203 {offsets = [0, 8], sizes = [10, 8], strides = [1, 1]} : vector<10x96xf32> to vector<10x8xf32>
    %229 = vector.extract_strided_slice %203 {offsets = [0, 40], sizes = [10, 8], strides = [1, 1]} : vector<10x96xf32> to vector<10x8xf32>
    %230 = vector.extract_strided_slice %203 {offsets = [0, 72], sizes = [10, 8], strides = [1, 1]} : vector<10x96xf32> to vector<10x8xf32>
    %cst_106 = arith.constant dense<0.000000e+00> : vector<10x10xf32>
    %231 = tpu.matmul %228, %229, %cst_106 {dimension_numbers = #tpu.dot_dimension_numbers<[1], [1], [0], [0], [0, 0, 1, 0], [], []>} : vector<10x8xf32>, vector<10x8xf32>, vector<10x10xf32> -> vector<10x10xf32>
    %cst_107 = arith.constant 0.353553385 : f32
    %232 = vector.broadcast %cst_107 : f32 to vector<10x10xf32>
    %233 = arith.mulf %231, %232 : vector<10x10xf32>
    %234 = arith.addf %233, %5 : vector<10x10xf32>
    %cst_108 = arith.constant dense<0xFF800000> : vector<10xf32>
    %235 = vector.multi_reduction <maximumf>, %234, %cst_108 [1] : vector<10x10xf32> to vector<10xf32>
    %236 = vector.shape_cast %235 : vector<10xf32> to vector<10x1xf32>
    %237 = vector.broadcast %236 : vector<10x1xf32> to vector<10x10xf32>
    %238 = arith.subf %234, %237 : vector<10x10xf32>
    %239 = math.exp %238 : vector<10x10xf32>
    %cst_109 = arith.constant dense<0.000000e+00> : vector<10xf32>
    %240 = vector.multi_reduction <add>, %239, %cst_109 [1] : vector<10x10xf32> to vector<10xf32>
    %241 = vector.shape_cast %240 : vector<10xf32> to vector<10x1xf32>
    %242 = tpu.reciprocal %241 {approx = true} : vector<10x1xf32> -> vector<10x1xf32>
    %243 = vector.broadcast %242 : vector<10x1xf32> to vector<10x10xf32>
    %244 = arith.mulf %239, %243 : vector<10x10xf32>
    %cst_110 = arith.constant dense<0.000000e+00> : vector<10x8xf32>
    %245 = tpu.matmul %244, %230, %cst_110 {dimension_numbers = #tpu.dot_dimension_numbers<[1], [0], [0], [1], [0, 0, 1, 1], [], []>} : vector<10x10xf32>, vector<10x8xf32>, vector<10x8xf32> -> vector<10x8xf32>
    %246 = vector.extract_strided_slice %205 {offsets = [8, 0], sizes = [8, 32], strides = [1, 1]} : vector<32x32xf32> to vector<8x32xf32>
    %cst_111 = arith.constant dense<0.000000e+00> : vector<10x32xf32>
    %247 = tpu.matmul %245, %246, %cst_111 {dimension_numbers = #tpu.dot_dimension_numbers<[1], [0], [0], [1], [0, 0, 1, 1], [], []>} : vector<10x8xf32>, vector<8x32xf32>, vector<10x32xf32> -> vector<10x32xf32>
    %248 = arith.addf %227, %247 : vector<10x32xf32>
    %249 = vector.extract_strided_slice %203 {offsets = [0, 16], sizes = [10, 8], strides = [1, 1]} : vector<10x96xf32> to vector<10x8xf32>
    %250 = vector.extract_strided_slice %203 {offsets = [0, 48], sizes = [10, 8], strides = [1, 1]} : vector<10x96xf32> to vector<10x8xf32>
    %251 = vector.extract_strided_slice %203 {offsets = [0, 80], sizes = [10, 8], strides = [1, 1]} : vector<10x96xf32> to vector<10x8xf32>
    %cst_112 = arith.constant dense<0.000000e+00> : vector<10x10xf32>
    %252 = tpu.matmul %249, %250, %cst_112 {dimension_numbers = #tpu.dot_dimension_numbers<[1], [1], [0], [0], [0, 0, 1, 0], [], []>} : vector<10x8xf32>, vector<10x8xf32>, vector<10x10xf32> -> vector<10x10xf32>
    %cst_113 = arith.constant 0.353553385 : f32
    %253 = vector.broadcast %cst_113 : f32 to vector<10x10xf32>
    %254 = arith.mulf %252, %253 : vector<10x10xf32>
    %255 = arith.addf %254, %5 : vector<10x10xf32>
    %cst_114 = arith.constant dense<0xFF800000> : vector<10xf32>
    %256 = vector.multi_reduction <maximumf>, %255, %cst_114 [1] : vector<10x10xf32> to vector<10xf32>
    %257 = vector.shape_cast %256 : vector<10xf32> to vector<10x1xf32>
    %258 = vector.broadcast %257 : vector<10x1xf32> to vector<10x10xf32>
    %259 = arith.subf %255, %258 : vector<10x10xf32>
    %260 = math.exp %259 : vector<10x10xf32>
    %cst_115 = arith.constant dense<0.000000e+00> : vector<10xf32>
    %261 = vector.multi_reduction <add>, %260, %cst_115 [1] : vector<10x10xf32> to vector<10xf32>
    %262 = vector.shape_cast %261 : vector<10xf32> to vector<10x1xf32>
    %263 = tpu.reciprocal %262 {approx = true} : vector<10x1xf32> -> vector<10x1xf32>
    %264 = vector.broadcast %263 : vector<10x1xf32> to vector<10x10xf32>
    %265 = arith.mulf %260, %264 : vector<10x10xf32>
    %cst_116 = arith.constant dense<0.000000e+00> : vector<10x8xf32>
    %266 = tpu.matmul %265, %251, %cst_116 {dimension_numbers = #tpu.dot_dimension_numbers<[1], [0], [0], [1], [0, 0, 1, 1], [], []>} : vector<10x10xf32>, vector<10x8xf32>, vector<10x8xf32> -> vector<10x8xf32>
    %267 = vector.extract_strided_slice %205 {offsets = [16, 0], sizes = [8, 32], strides = [1, 1]} : vector<32x32xf32> to vector<8x32xf32>
    %cst_117 = arith.constant dense<0.000000e+00> : vector<10x32xf32>
    %268 = tpu.matmul %266, %267, %cst_117 {dimension_numbers = #tpu.dot_dimension_numbers<[1], [0], [0], [1], [0, 0, 1, 1], [], []>} : vector<10x8xf32>, vector<8x32xf32>, vector<10x32xf32> -> vector<10x32xf32>
    %269 = arith.addf %248, %268 : vector<10x32xf32>
    %270 = vector.extract_strided_slice %203 {offsets = [0, 24], sizes = [10, 8], strides = [1, 1]} : vector<10x96xf32> to vector<10x8xf32>
    %271 = vector.extract_strided_slice %203 {offsets = [0, 56], sizes = [10, 8], strides = [1, 1]} : vector<10x96xf32> to vector<10x8xf32>
    %272 = vector.extract_strided_slice %203 {offsets = [0, 88], sizes = [10, 8], strides = [1, 1]} : vector<10x96xf32> to vector<10x8xf32>
    %cst_118 = arith.constant dense<0.000000e+00> : vector<10x10xf32>
    %273 = tpu.matmul %270, %271, %cst_118 {dimension_numbers = #tpu.dot_dimension_numbers<[1], [1], [0], [0], [0, 0, 1, 0], [], []>} : vector<10x8xf32>, vector<10x8xf32>, vector<10x10xf32> -> vector<10x10xf32>
    %cst_119 = arith.constant 0.353553385 : f32
    %274 = vector.broadcast %cst_119 : f32 to vector<10x10xf32>
    %275 = arith.mulf %273, %274 : vector<10x10xf32>
    %276 = arith.addf %275, %5 : vector<10x10xf32>
    %cst_120 = arith.constant dense<0xFF800000> : vector<10xf32>
    %277 = vector.multi_reduction <maximumf>, %276, %cst_120 [1] : vector<10x10xf32> to vector<10xf32>
    %278 = vector.shape_cast %277 : vector<10xf32> to vector<10x1xf32>
    %279 = vector.broadcast %278 : vector<10x1xf32> to vector<10x10xf32>
    %280 = arith.subf %276, %279 : vector<10x10xf32>
    %281 = math.exp %280 : vector<10x10xf32>
    %cst_121 = arith.constant dense<0.000000e+00> : vector<10xf32>
    %282 = vector.multi_reduction <add>, %281, %cst_121 [1] : vector<10x10xf32> to vector<10xf32>
    %283 = vector.shape_cast %282 : vector<10xf32> to vector<10x1xf32>
    %284 = tpu.reciprocal %283 {approx = true} : vector<10x1xf32> -> vector<10x1xf32>
    %285 = vector.broadcast %284 : vector<10x1xf32> to vector<10x10xf32>
    %286 = arith.mulf %281, %285 : vector<10x10xf32>
    %cst_122 = arith.constant dense<0.000000e+00> : vector<10x8xf32>
    %287 = tpu.matmul %286, %272, %cst_122 {dimension_numbers = #tpu.dot_dimension_numbers<[1], [0], [0], [1], [0, 0, 1, 1], [], []>} : vector<10x10xf32>, vector<10x8xf32>, vector<10x8xf32> -> vector<10x8xf32>
    %288 = vector.extract_strided_slice %205 {offsets = [24, 0], sizes = [8, 32], strides = [1, 1]} : vector<32x32xf32> to vector<8x32xf32>
    %cst_123 = arith.constant dense<0.000000e+00> : vector<10x32xf32>
    %289 = tpu.matmul %287, %288, %cst_123 {dimension_numbers = #tpu.dot_dimension_numbers<[1], [0], [0], [1], [0, 0, 1, 1], [], []>} : vector<10x8xf32>, vector<8x32xf32>, vector<10x32xf32> -> vector<10x32xf32>
    %290 = arith.addf %269, %289 : vector<10x32xf32>
    %291 = arith.addf %176, %290 : vector<10x32xf32>
    %c1_124 = arith.constant 1 : index
    %c0_125 = arith.constant 0 : index
    %c0_126 = arith.constant 0 : index
    %292 = vector.load %arg8[%c1_124, %c0_125, %c0_126] : memref<2x1x32xf32, #tpu.memory_space<vmem>>, vector<1x1x32xf32>
    %293 = vector.shape_cast %292 : vector<1x1x32xf32> to vector<1x32xf32>
    %294 = vector.broadcast %293 : vector<1x32xf32> to vector<10x32xf32>
    %295 = arith.addf %291, %294 : vector<10x32xf32>
    %c1_127 = arith.constant 1 : index
    %c0_128 = arith.constant 0 : index
    %c0_129 = arith.constant 0 : index
    %296 = vector.load %arg9[%c1_127, %c0_128, %c0_129] : memref<2x1x32xf32, #tpu.memory_space<vmem>>, vector<1x1x32xf32>
    %297 = vector.shape_cast %296 : vector<1x1x32xf32> to vector<1x32xf32>
    %c1_130 = arith.constant 1 : index
    %c0_131 = arith.constant 0 : index
    %c0_132 = arith.constant 0 : index
    %298 = vector.load %arg10[%c1_130, %c0_131, %c0_132] : memref<2x1x32xf32, #tpu.memory_space<vmem>>, vector<1x1x32xf32>
    %299 = vector.shape_cast %298 : vector<1x1x32xf32> to vector<1x32xf32>
    %cst_133 = arith.constant dense<0.000000e+00> : vector<10xf32>
    %300 = vector.multi_reduction <add>, %295, %cst_133 [1] : vector<10x32xf32> to vector<10xf32>
    %301 = vector.shape_cast %300 : vector<10xf32> to vector<10x1xf32>
    %cst_134 = arith.constant 3.200000e+01 : f32
    %302 = vector.broadcast %cst_134 : f32 to vector<10x1xf32>
    %303 = arith.divf %301, %302 : vector<10x1xf32>
    %304 = vector.broadcast %303 : vector<10x1xf32> to vector<10x32xf32>
    %305 = arith.subf %295, %304 : vector<10x32xf32>
    %306 = arith.mulf %305, %305 : vector<10x32xf32>
    %cst_135 = arith.constant dense<0.000000e+00> : vector<10xf32>
    %307 = vector.multi_reduction <add>, %306, %cst_135 [1] : vector<10x32xf32> to vector<10xf32>
    %308 = vector.shape_cast %307 : vector<10xf32> to vector<10x1xf32>
    %cst_136 = arith.constant 3.200000e+01 : f32
    %309 = vector.broadcast %cst_136 : f32 to vector<10x1xf32>
    %310 = arith.divf %308, %309 : vector<10x1xf32>
    %cst_137 = arith.constant 9.99999974E-6 : f32
    %311 = vector.broadcast %cst_137 : f32 to vector<10x1xf32>
    %312 = arith.addf %310, %311 : vector<10x1xf32>
    %313 = math.rsqrt %312 : vector<10x1xf32>
    %314 = vector.broadcast %313 : vector<10x1xf32> to vector<10x32xf32>
    %315 = arith.mulf %305, %314 : vector<10x32xf32>
    %316 = vector.broadcast %297 : vector<1x32xf32> to vector<10x32xf32>
    %317 = arith.mulf %315, %316 : vector<10x32xf32>
    %318 = vector.broadcast %299 : vector<1x32xf32> to vector<10x32xf32>
    %319 = arith.addf %317, %318 : vector<10x32xf32>
    %c1_138 = arith.constant 1 : index
    %c0_139 = arith.constant 0 : index
    %c0_140 = arith.constant 0 : index
    %320 = vector.load %arg11[%c1_138, %c0_139, %c0_140] : memref<2x32x64xf32, #tpu.memory_space<vmem>>, vector<1x32x64xf32>
    %321 = vector.shape_cast %320 : vector<1x32x64xf32> to vector<32x64xf32>
    %cst_141 = arith.constant dense<0.000000e+00> : vector<10x64xf32>
    %322 = tpu.matmul %319, %321, %cst_141 {dimension_numbers = #tpu.dot_dimension_numbers<[1], [0], [0], [1], [0, 0, 1, 1], [], []>} : vector<10x32xf32>, vector<32x64xf32>, vector<10x64xf32> -> vector<10x64xf32>
    %c1_142 = arith.constant 1 : index
    %c0_143 = arith.constant 0 : index
    %c0_144 = arith.constant 0 : index
    %323 = vector.load %arg12[%c1_142, %c0_143, %c0_144] : memref<2x1x64xf32, #tpu.memory_space<vmem>>, vector<1x1x64xf32>
    %324 = vector.shape_cast %323 : vector<1x1x64xf32> to vector<1x64xf32>
    %325 = vector.broadcast %324 : vector<1x64xf32> to vector<10x64xf32>
    %326 = arith.addf %322, %325 : vector<10x64xf32>
    %cst_145 = arith.constant 4.471500e-02 : f32
    %327 = vector.broadcast %cst_145 : f32 to vector<10x64xf32>
    %328 = arith.mulf %327, %326 : vector<10x64xf32>
    %329 = arith.mulf %328, %326 : vector<10x64xf32>
    %330 = arith.mulf %329, %326 : vector<10x64xf32>
    %331 = arith.addf %326, %330 : vector<10x64xf32>
    %cst_146 = arith.constant 0.797884583 : f32
    %332 = vector.broadcast %cst_146 : f32 to vector<10x64xf32>
    %333 = arith.mulf %332, %331 : vector<10x64xf32>
    %cst_147 = arith.constant 5.000000e-01 : f32
    %334 = vector.broadcast %cst_147 : f32 to vector<10x64xf32>
    %335 = arith.mulf %334, %326 : vector<10x64xf32>
    %336 = math.tanh %333 : vector<10x64xf32>
    %cst_148 = arith.constant 1.000000e+00 : f32
    %337 = vector.broadcast %cst_148 : f32 to vector<10x64xf32>
    %338 = arith.addf %337, %336 : vector<10x64xf32>
    %339 = arith.mulf %335, %338 : vector<10x64xf32>
    %c1_149 = arith.constant 1 : index
    %c0_150 = arith.constant 0 : index
    %c0_151 = arith.constant 0 : index
    %340 = vector.load %arg13[%c1_149, %c0_150, %c0_151] : memref<2x64x32xf32, #tpu.memory_space<vmem>>, vector<1x64x32xf32>
    %341 = vector.shape_cast %340 : vector<1x64x32xf32> to vector<64x32xf32>
    %cst_152 = arith.constant dense<0.000000e+00> : vector<10x32xf32>
    %342 = tpu.matmul %339, %341, %cst_152 {dimension_numbers = #tpu.dot_dimension_numbers<[1], [0], [0], [1], [0, 0, 1, 1], [], []>} : vector<10x64xf32>, vector<64x32xf32>, vector<10x32xf32> -> vector<10x32xf32>
    %c1_153 = arith.constant 1 : index
    %c0_154 = arith.constant 0 : index
    %c0_155 = arith.constant 0 : index
    %343 = vector.load %arg14[%c1_153, %c0_154, %c0_155] : memref<2x1x32xf32, #tpu.memory_space<vmem>>, vector<1x1x32xf32>
    %344 = vector.shape_cast %343 : vector<1x1x32xf32> to vector<1x32xf32>
    %345 = vector.broadcast %344 : vector<1x32xf32> to vector<10x32xf32>
    %346 = arith.addf %342, %345 : vector<10x32xf32>
    %347 = arith.addf %295, %346 : vector<10x32xf32>
    %c0_156 = arith.constant 0 : index
    %c0_157 = arith.constant 0 : index
    %348 = vector.load %arg15[%c0_156, %c0_157] : memref<1x32xf32, #tpu.memory_space<vmem>>, vector<1x32xf32>
    %c0_158 = arith.constant 0 : index
    %c0_159 = arith.constant 0 : index
    %349 = vector.load %arg16[%c0_158, %c0_159] : memref<1x32xf32, #tpu.memory_space<vmem>>, vector<1x32xf32>
    %cst_160 = arith.constant dense<0.000000e+00> : vector<10xf32>
    %350 = vector.multi_reduction <add>, %347, %cst_160 [1] : vector<10x32xf32> to vector<10xf32>
    %351 = vector.shape_cast %350 : vector<10xf32> to vector<10x1xf32>
    %cst_161 = arith.constant 3.200000e+01 : f32
    %352 = vector.broadcast %cst_161 : f32 to vector<10x1xf32>
    %353 = arith.divf %351, %352 : vector<10x1xf32>
    %354 = vector.broadcast %353 : vector<10x1xf32> to vector<10x32xf32>
    %355 = arith.subf %347, %354 : vector<10x32xf32>
    %356 = arith.mulf %355, %355 : vector<10x32xf32>
    %cst_162 = arith.constant dense<0.000000e+00> : vector<10xf32>
    %357 = vector.multi_reduction <add>, %356, %cst_162 [1] : vector<10x32xf32> to vector<10xf32>
    %358 = vector.shape_cast %357 : vector<10xf32> to vector<10x1xf32>
    %cst_163 = arith.constant 3.200000e+01 : f32
    %359 = vector.broadcast %cst_163 : f32 to vector<10x1xf32>
    %360 = arith.divf %358, %359 : vector<10x1xf32>
    %cst_164 = arith.constant 9.99999974E-6 : f32
    %361 = vector.broadcast %cst_164 : f32 to vector<10x1xf32>
    %362 = arith.addf %360, %361 : vector<10x1xf32>
    %363 = math.rsqrt %362 : vector<10x1xf32>
    %364 = vector.broadcast %363 : vector<10x1xf32> to vector<10x32xf32>
    %365 = arith.mulf %355, %364 : vector<10x32xf32>
    %366 = vector.broadcast %348 : vector<1x32xf32> to vector<10x32xf32>
    %367 = arith.mulf %365, %366 : vector<10x32xf32>
    %368 = vector.broadcast %349 : vector<1x32xf32> to vector<10x32xf32>
    %369 = arith.addf %367, %368 : vector<10x32xf32>
    %c0_165 = arith.constant 0 : index
    %c0_166 = arith.constant 0 : index
    %370 = vector.load %arg17[%c0_165, %c0_166] : memref<32x10xf32, #tpu.memory_space<vmem>>, vector<32x10xf32>
    %cst_167 = arith.constant dense<0.000000e+00> : vector<10x10xf32>
    %371 = tpu.matmul %369, %370, %cst_167 {dimension_numbers = #tpu.dot_dimension_numbers<[1], [0], [0], [1], [0, 0, 1, 1], [], []>} : vector<10x32xf32>, vector<32x10xf32>, vector<10x10xf32> -> vector<10x10xf32>
    %c0_168 = arith.constant 0 : index
    %c0_169 = arith.constant 0 : index
    %372 = vector.load %arg18[%c0_168, %c0_169] : memref<1x10xf32, #tpu.memory_space<vmem>>, vector<1x10xf32>
    %373 = vector.broadcast %372 : vector<1x10xf32> to vector<10x10xf32>
    %374 = arith.addf %371, %373 : vector<10x10xf32>
    %375 = vector.extract_strided_slice %374 {offsets = [0, 0], sizes = [1, 10], strides = [1, 1]} : vector<10x10xf32> to vector<1x10xf32>
    %c0_170 = arith.constant 0 : index
    %c0_171 = arith.constant 0 : index
    %376 = vector.load %arg19[%c0_170, %c0_171] : memref<2x10xf32, #tpu.memory_space<vmem>>, vector<1x10xf32>
    tpu.vector_store %arg19[%c0_170, %c0_171], %375 {strides = array<i32>} : memref<2x10xf32, #tpu.memory_space<vmem>>, vector<1x10xf32>,
    %377 = vector.extract_strided_slice %374 {offsets = [5, 0], sizes = [1, 10], strides = [1, 1]} : vector<10x10xf32> to vector<1x10xf32>
    %c1_172 = arith.constant 1 : index
    %c0_173 = arith.constant 0 : index
    %378 = vector.load %arg19[%c1_172, %c0_173] : memref<2x10xf32, #tpu.memory_space<vmem>>, vector<1x10xf32>
    tpu.vector_store %arg19[%c1_172, %c0_173], %377 {strides = array<i32>} : memref<2x10xf32, #tpu.memory_space<vmem>>, vector<1x10xf32>,
    return
  }
}

</mosaic_0001>

<bundles_post_ra>
// kernel: tile.9
= control target key start
LH: loop header
LB: loop body
LE: loop exit
PB: predicated region body
PF: predicated region fallthrough
CT: control target
= control target key end

     0   :  { %vm3_vm0 = vcmask 261120   ;;  %s34_s0 = inlined_call_operand.vmem [shape: f32[2,5,32], index: 0, kind: input, shape index: {}]   ;;  %s35_s1 = inlined_call_operand.vmem [shape: f32[10,32], index: 1, kind: output, shape index: {}]  }
   0x1   :  { %v2_v0 = vld [vmem:[%s34_s0] sm:$0x1f]   ;;  %v10_v1 = vld [vmem:[%s34_s0 + $0x8] sm:$0x1f]  }
   0x2   :  { %4 = vst.msk [vmem:[%s35_s1] sm:$0x1f] %vm3_vm0, %v2_v0   ;;  %11 = vst.msk [vmem:[%s35_s1 + $0x5] sm:$0x1f] %vm3_vm0, %v10_v1  }

// kernel: moco_vit_classifier_forward.1
= control target key start
LH: loop header
LB: loop body
LE: loop exit
PB: predicated region body
PF: predicated region fallthrough
CT: control target
= control target key end

     0   :  { %s5125_s0 = inlined_call_operand.vmem [shape: f32[10,192], index: 0, kind: input, shape index: {}]   ;;  %s5126_s1 = inlined_call_operand.vmem [shape: f32[10,32], index: 1, kind: input, shape index: {}]   ;;  %s5127_s2 = inlined_call_operand.vmem [shape: f32[10,10], index: 2, kind: input, shape index: {}]   ;;  %s5128_s3 = inlined_call_operand.vmem [shape: f32[192,32], index: 3, kind: input, shape index: {}]   ;;  %s5129_s4 = inlined_call_operand.vmem [shape: f32[2,1,32], index: 4, kind: input, shape index: {}]   ;;  %s5130_s5 = inlined_call_operand.vmem [shape: f32[2,1,32], index: 5, kind: input, shape index: {}]   ;;  %s5131_s6 = inlined_call_operand.vmem [shape: f32[2,32,96], index: 6, kind: input, shape index: {}]   ;;  %s5132_s7 = inlined_call_operand.vmem [shape: f32[2,32,32], index: 7, kind: input, shape index: {}]   ;;  %s5133_s8 = inlined_call_operand.vmem [shape: f32[2,1,32], index: 8, kind: input, shape index: {}]   ;;  %s5134_s9 = inlined_call_operand.vmem [shape: f32[2,1,32], index: 9, kind: input, shape index: {}]   ;;  %s5135_s10 = inlined_call_operand.vmem [shape: f32[2,1,32], index: 10, kind: input, shape index: {}]   ;;  %s5136_s11 = inlined_call_operand.vmem [shape: f32[2,32,64], index: 11, kind: input, shape index: {}]   ;;  %s5137_s12 = inlined_call_operand.vmem [shape: f32[2,1,64], index: 12, kind: input, shape index: {}]   ;;  %s5138_s13 = inlined_call_operand.vmem [shape: f32[2,64,32], index: 13, kind: input, shape index: {}]   ;;  %s5139_s14 = inlined_call_operand.vmem [shape: f32[2,1,32], index: 14, kind: input, shape index: {}]   ;;  %s5140_s15 = inlined_call_operand.vmem [shape: f32[1,32], index: 15, kind: input, shape index: {}]   ;;  %s5141_s16 = inlined_call_operand.vmem [shape: f32[1,32], index: 16, kind: input, shape index: {}]   ;;  %s5142_s17 = inlined_call_operand.vmem [shape: f32[32,10], index: 17, kind: input, shape index: {}]   ;;  %s5143_s18 = inlined_call_operand.vmem [shape: f32[1,10], index: 18, kind: input, shape index: {}]   ;;  %s5144_s19 = inlined_call_operand.hbm [shape: f32[2,10], index: 19, kind: output, shape index: {}]  }
   0x1   :  { %5157 = sst [smem:[#allocation5_spill]] %s5125_s0 }
   0x2   :  { %5158 = sst [smem:[#allocation6_spill]] %s5126_s1 }
   0x3   :  { %5159 = sst [smem:[#allocation7_spill]] %s5127_s2 }
   0x4   :  { %5160 = sst [smem:[#allocation8_spill]] %s5128_s3 }
   0x5   :  { %s5161_s20 = sld [smem:[#allocation8_spill]]  ;;  %v4375_v3 = vmov 0.0|0.0   ;;  %vm93_vm0 = vcmask 523264   ;;  %s5162_s22 = sld [smem:[#allocation5_spill]] }
   0x6   :  { %3947 = vmatprep.subr.bf16.mxu0 %v4375_v3 }
   0xb   :  { %v67_v0 = vld [vmem:[%s5161_s20] sm:$0xff]  ;;  %v68_v1 = vld [vmem:[%s5161_s20 + $0x8] sm:$0xff]  ;;  %v69_v2 = vld [vmem:[%s5161_s20 + $0x10] sm:$0xff] }
   0xc   :  { %v3948_v4 = vpack.c.bf16 %v68_v1, %v67_v0  ;;  %v70_v5 = vld [vmem:[%s5161_s20 + $0x18] sm:$0xff]  ;;  %v71_v7 = vld [vmem:[%s5161_s20 + $0x20] sm:$0xff]  ;;  %v72_v8 = vld [vmem:[%s5161_s20 + $0x28] sm:$0xff] }
   0xd   :  { %v3951_v6 = vpack.c.bf16 %v70_v5, %v69_v2  ;;  %v3954_v9 = vpack.c.bf16 %v72_v8, %v71_v7  ;;  %v73_v10 = vld [vmem:[%s5161_s20 + $0x30] sm:$0xff]  ;;  %v74_v11 = vld [vmem:[%s5161_s20 + $0x38] sm:$0xff]  ;;  %v64_v12 = vld [vmem:[%s5162_s22 + $0x8] sm:$0xff] }
   0xe   :  { %3949 = vmatpush1.bf16.msra.mxu0 %v3948_v4  ;;  %3432 = vmatprep.mubr.msk.f32.mxu0 %vm93_vm0, %v64_v12 }
   0xf   :  { %3950 = vmatprep.subr.bf16.mxu0 %v4375_v3 }
  0x12   :  { %3952 = vmatpush1.bf16.msra.mxu0 %v3951_v6 }
  0x13   :  { %3953 = vmatprep.subr.bf16.mxu0 %v4375_v3 }
  0x14   :  { %24 = vsyncpa [#allocation3], 0  ;;  %v3957_v13 = vpack.c.bf16 %v74_v11, %v73_v10  ;;  %v75_v14 = vld [vmem:[%s5161_s20 + $0x40] sm:$0xff]  ;;  %v76_v15 = vld [vmem:[%s5161_s20 + $0x48] sm:$0xff]  ;;  %s5163_s2 = sld [smem:[#allocation6_spill]]  ;;  %vm179_vm1 = vcmask 261120  }
  0x15   :  { %v3960_v16 = vpack.c.bf16 %v76_v15, %v75_v14  ;;  %v77_v17 = vld [vmem:[%s5161_s20 + $0x50] sm:$0xff]  ;;  %v78_v18 = vld [vmem:[%s5161_s20 + $0x58] sm:$0xff]  ;;  %v79_v20 = vld [vmem:[%s5161_s20 + $0x60] sm:$0xff]  ;;  %vm183_vm2 = vcmask 254976   ;;  %vm319_vm3 = vcmask 64512   ;;  %s4377_s23 = smov 88  }
  0x16   :  { %3955 = vmatpush1.bf16.msra.mxu0 %v3954_v9  ;;  %v3963_v19 = vpack.c.bf16 %v78_v18, %v77_v17  ;;  %v80_v21 = vld [vmem:[%s5161_s20 + $0x68] sm:$0xff]  ;;  %v81_v23 = vld [vmem:[%s5161_s20 + $0x70] sm:$0xff]  ;;  %v82_v24 = vld [vmem:[%s5161_s20 + $0x78] sm:$0xff]  ;;  %s4378_s24 = smov 120   ;;  %s5166_s3 = sld [smem:[#allocation7_spill]]  ;;  %vm407_vm5 = vcmask 80896  }
  0x17   :  { %3956 = vmatprep.subr.bf16.mxu0 %v4375_v3  ;;  %v3966_v22 = vpack.c.bf16 %v80_v21, %v79_v20  ;;  %v3969_v25 = vpack.c.bf16 %v82_v24, %v81_v23  ;;  %v83_v26 = vld [vmem:[%s5161_s20 + $0x80] sm:$0xff]  ;;  %v84_v27 = vld [vmem:[%s5161_s20 + $0x88] sm:$0xff]  ;;  %v85_v29 = vld [vmem:[%s5161_s20 + $0x90] sm:$0xff]  ;;  %vm411_vm6 = vcmask 74752   ;;  %s5156_s28 = smov 64   ;;  %vm442_vm7 = vcmask 1041408  }
  0x18   :  { %v3972_v28 = vpack.c.bf16 %v84_v27, %v83_v26  ;;  %v86_v30 = vld [vmem:[%s5161_s20 + $0x98] sm:$0xff]  ;;  %v87_v32 = vld [vmem:[%s5161_s20 + $0xa0] sm:$0xff]  ;;  %v88_v33 = vld [vmem:[%s5161_s20 + $0xa8] sm:$0xff]  ;;  %vm4380_vm8 = vmmov 1   ;;  %s5151_s29 = smov 56   ;;  %s4382_s0 = smov 112  }
  0x19   :  { %v3975_v31 = vpack.c.bf16 %v86_v30, %v85_v29  ;;  %v3978_v34 = vpack.c.bf16 %v88_v33, %v87_v32  ;;  %v89_v35 = vld [vmem:[%s5161_s20 + $0xb0] sm:$0xff]  ;;  %v90_v36 = vld [vmem:[%s5161_s20 + $0xb8] sm:$0xff]  ;;  %v63_v38 = vld [vmem:[%s5162_s22] sm:$0xff]  ;;  %s5154_s30 = smov 72   ;;  %s5152_s21 = smov 104   ;;  %vm3414_vm10 = vcmask 73728  }
  0x1a   :  { %3958 = vmatpush1.bf16.msra.mxu0 %v3957_v13  ;;  %v3981_v37 = vpack.c.bf16 %v90_v36, %v89_v35  ;;  %v66_v39 = vld [vmem:[%s5162_s22 + $0x18] sm:$0x3]  ;;  %v65_v40 = vld [vmem:[%s5162_s22 + $0x10] sm:$0x3]  ;;  %v91_v41 = vld [vmem:[%s5163_s2] sm:$0xff]  ;;  %s5155_s20 = smov 80  }
  0x1b   :  { %3959 = vmatprep.subr.bf16.mxu0 %v4375_v3  ;;  %v92_v45 = vld [vmem:[%s5163_s2 + $0x8] sm:$0x3]  ;;  %v224_v61 = vld [vmem:[%s5131_s6] sm:$0xff]  ;;  %v226_v63 = vld [vmem:[%s5131_s6 + $0x10] sm:$0xff]  ;;  %s4376_s2 = smov 96   ;;  %s5149_s27 = smov 40  }
  0x1c   :  { %v225_v62 = vld [vmem:[%s5131_s6 + $0x8] sm:$0xff]  ;;  %v227_v1 = vld [vmem:[%s5131_s6 + $0x18] sm:$0xff]  ;;  %v3434_v10 = vld [vmem:[%s5129_s4] ss:$0 sm:$0xff]  ;;  %s5150_s1 = smov 48   ;;  %vm3416_vm11 = vcmask 78853  }
  0x1d   :  { %v3983_v0 = vpack.c.bf16 %v225_v62, %v224_v61  ;;  %v3987_v2 = vpack.c.bf16 %v227_v1, %v226_v63  ;;  %v3435_v12 = vld [vmem:[%s5130_s5] ss:$0 sm:$0xff]  ;;  %vm4633_vm4 = vmpackc.low %vm319_vm3, %vm319_vm3  ;;  %v4651_v32 = vld [vmem:[%s5166_s3 + $0x8] sm:$0x3] }
  0x1e   :  { %3961 = vmatpush1.bf16.msra.mxu0 %v3960_v16  ;;  %v4646_v29 = vld [vmem:[%s5166_s3] sm:$0xff]  ;;  %vm4661_vm9 = vmpackc.low %vm442_vm7, %vm4380_vm8 }
  0x1f   :  { %3962 = vmatprep.subr.bf16.mxu0 %v4375_v3  ;;  %3984 = vmatprep.subr.bf16.mxu1 %v3983_v0 }
  0x20   :  { %3986 = vmatpush3.bf16.msra.mxu1 %v3983_v0 }
  0x21   :  { %3988 = vmatprep.subr.bf16.mxu1 %v3987_v2 }
  0x22   :  { %3964 = vmatpush1.bf16.msra.mxu0 %v3963_v19 }
  0x23   :  { %3965 = vmatprep.subr.bf16.mxu0 %v4375_v3 }
  0x24   :  { %3990 = vmatpush3.bf16.msra.mxu1 %v3987_v2 }
  0x26   :  { %3967 = vmatpush1.bf16.msra.mxu0 %v3966_v22 }
  0x27   :  { %3968 = vmatprep.subr.bf16.mxu0 %v4375_v3 }
  0x2a   :  { %3970 = vmatpush1.bf16.msra.mxu0 %v3969_v25  ;;  %v4349_v25 = vld [vmem:[%s5166_s3] sm:$0xff] }
  0x2b   :  { %3971 = vmatprep.subr.bf16.mxu0 %v4375_v3 }
  0x2e   :  { %3973 = vmatpush1.bf16.msra.mxu0 %v3972_v28 }
  0x2f   :  { %3974 = vmatprep.subr.bf16.mxu0 %v4375_v3 }
  0x32   :  { %3976 = vmatpush1.bf16.msra.mxu0 %v3975_v31 }
  0x33   :  { %3977 = vmatprep.subr.bf16.mxu0 %v4375_v3 }
  0x36   :  { %3979 = vmatpush1.bf16.msra.mxu0 %v3978_v34 }
  0x37   :  { %3980 = vmatprep.subr.bf16.mxu0 %v4375_v3 }
  0x3a   :  { %3982 = vmatpush1.bf16.msra.mxu0 %v3981_v37 }
  0x3d   :  { %165 = vmatmul.mubr.f32.vlgmr.msra.gmra.mrb[0].mxu0 %v63_v38 }
  0x3e   :  { %3433 = vmatprep.mubr.msk.f32.mxu0 %vm93_vm0, %v66_v39 }
  0x41   :  { %170 = vmatmul.mubr.f32.gmra.mrb[2].mxu0 %v65_v40 }
 0x110   :  { %v166_v42 = vpop.f32.mrb[0].mxu0 }
 0x111   :  { %v4578_v43 = vadd.f32 %v166_v42, %v91_v41  ;;  %v168_v44 = vpop.f32.mrb[1].mxu0 }
 0x113   :  { %v180_v46 = vsel %vm179_vm1, %v4578_v43, 0.0 }
 0x114   :  { %v171_v47 = vpop.f32.mrb[2].mxu0  ;;  %181 = vadd.xlane.f32.xlu0 %v180_v46 }
 0x115   :  { %v4585_v48 = vadd.f32 %v171_v47, %v92_v45  ;;  %v173_v49 = vpop.f32.mrb[3].mxu0 }
 0x117   :  { %v184_v50 = vsel %vm183_vm2, %v4585_v48, 0.0 }
 0x118   :  { %185 = vadd.xlane.f32.xlu0 %v184_v50 }
 0x1a1   :  { %v182_v51 = vpop.xlane.xlu0 %181 }
 0x1a2   :  { %v188_v52 = vmul.f32 0.03125, %v182_v51 }
 0x1a4   :  { %v190_v53 = vsub.f32 %v4578_v43, %v188_v52 }
 0x1a5   :  { %v186_v54 = vpop.xlane.xlu0 %185 }
 0x1a6   :  { %v189_v55 = vmul.f32 0.03125, %v186_v54  ;;  %v192_v56 = vmul.f32 %v190_v53, %v190_v53 }
 0x1a8   :  { %v191_v57 = vsub.f32 %v4585_v48, %v189_v55  ;;  %v194_v58 = vsel %vm179_vm1, %v192_v56, 0.0 }
 0x1a9   :  { %195 = vadd.xlane.f32.xlu1 %v194_v58 }
 0x1aa   :  { %v193_v59 = vmul.f32 %v191_v57, %v191_v57 }
 0x1ac   :  { %v197_v60 = vsel %vm183_vm2, %v193_v59, 0.0 }
 0x1ad   :  { %198 = vadd.xlane.f32.xlu1 %v197_v60 }
 0x236   :  { %v196_v3 = vpop.xlane.xlu1 %195 }
 0x237   :  { %v200_v4 = vmul.f32 0.03125, %v196_v3 }
 0x239   :  { %v202_v5 = vadd.f32 1e-05, %v200_v4 }
 0x23a   :  { %v199_v6 = vpop.xlane.xlu1 %198 }
 0x23b   :  { %4257 = vrsqrt.f32 %v202_v5  ;;  %v201_v7 = vmul.f32 0.03125, %v199_v6 }
 0x23d   :  { %v203_v8 = vadd.f32 1e-05, %v201_v7 }
 0x23f   :  { %4259 = vrsqrt.f32 %v203_v8 }
 0x245   :  { %v4258_v9 = vpop.eup %4257 }
 0x246   :  { %v206_v11 = vmul.f32 %v4258_v9, %v190_v53 }
 0x248   :  { %v214_v13 = vmul.f32 %v3434_v10, %v206_v11 }
 0x249   :  { %v4260_v14 = vpop.eup %4259 }
 0x24a   :  { %v207_v15 = vmul.f32 %v4260_v14, %v191_v57  ;;  %v222_v16 = vadd.f32 %v3435_v12, %v214_v13 }
 0x24c   :  { %v215_v17 = vmul.f32 %v3434_v10, %v207_v15  ;;  %3710 = vmatprep.mubr.msk.f32.mxu1 %vm179_vm1, %v222_v16 }
 0x24e   :  { %v223_v18 = vadd.f32 %v3435_v12, %v215_v17 }
 0x250   :  { %3711 = vmatmul.mubr.msk.f32.vlgmr.msra.gmra.mrb[0].mxu1 %vm179_vm1, %v223_v18 }
 0x323   :  { %v4613_v19 = vpop.f32.mrb[0].mxu1 }
 0x324   :  { %v4615_v20 = vpop.f32.mrb[1].mxu1 }
 0x325   :  { %3717 = vmatprep.mubr.msk.f32.mxu1 %vm319_vm3, %v4615_v20  ;;  %v4621_v21 = vpack.i.bf16 %v4613_v19, %v4615_v20 }
 0x327   :  { %4178 = vrot.lane.b32.xlu0 %v4621_v21, %s4376_s2 }
 0x32b   :  { %4188 = vrot.lane.b32.xlu0 %v4621_v21, %s4377_s23 }
 0x32f   :  { %520 = vrot.lane.b32.xlu0 %v4615_v20, %s4378_s24 }
 0x333   :  { %522 = vrot.lane.b32.xlu0 %v4613_v19, %s4378_s24 }
 0x399   :  { %v4179_v22 = vpop.permute.xlu0 %4178 }
 0x39a   :  { %v4181_v23 = vunpack.i.h.bf16 %v4179_v22  ;;  %v4180_v24 = vunpack.i.l.bf16 %v4179_v22 }
 0x39c   :  { %v3991_v26 = vpack.c.bf16 %v4181_v23, %v4180_v24 }
 0x39d   :  { %v4189_v51 = vpop.permute.xlu0 %4188 }
 0x39e   :  { %3993 = vmatprep.subr.msk.bf16.mxu1 %vm4633_vm4, %v3991_v26  ;;  %v4191_v53 = vunpack.i.h.bf16 %v4189_v51  ;;  %v4190_v54 = vunpack.i.l.bf16 %v4189_v51 }
 0x39f   :  { %3996 = vmatpush3.bf16.xpose.msk.msra.mxu1 %vm4633_vm4, %v3991_v26 }
 0x3a0   :  { %v4003_v59 = vpack.c.bf16 %v4191_v53, %v4190_v54 }
 0x3a1   :  { %v521_v0 = vpop.permute.xlu0 %520 }
 0x3a5   :  { %v523_v1 = vpop.permute.xlu0 %522 }
 0x3a6   :  { %3718 = vmatmul.mubr.msk.f32.vlgmr.msra.gmra.mrb[2].mxu1 %vm319_vm3, %v4613_v19 }
 0x479   :  { %v3719_v27 = vpop.f32.mrb[2].mxu1 }
 0x47a   :  { %v394_v28 = vpop.f32.mrb[3].mxu1  ;;  %v404_v30 = vmul.f32 0.35355338, %v3719_v27 }
 0x47b   :  { %v403_v31 = vmul.f32 0.35355338, %v394_v28 }
 0x47c   :  { %v406_v35 = vadd.f32 %v404_v30, %v4651_v32 }
 0x47d   :  { %v405_v33 = vadd.f32 %v403_v31, %v4646_v29 }
 0x47e   :  { %v412_v36 = vsel %vm411_vm6, %v406_v35, -inf }
 0x47f   :  { %v408_v34 = vsel %vm407_vm5, %v405_v33, -inf }
 0x480   :  { %409 = vmax.xlane.f32.xlu1 %v408_v34 }
 0x484   :  { %413 = vmax.xlane.f32.xlu1 %v412_v36 }
 0x50d   :  { %v410_v37 = vpop.xlane.xlu1 %409 }
 0x50e   :  { %v415_v38 = vsub.f32 %v405_v33, %v410_v37 }
 0x510   :  { %v417_v41 = vmul.f32 1.442695, %v415_v38 }
 0x511   :  { %v414_v39 = vpop.xlane.xlu1 %413 }
 0x512   :  { %v416_v40 = vsub.f32 %v406_v35, %v414_v39 }
 0x514   :  { %v419_v42 = vmul.f32 1.442695, %v416_v40 }
 0x516   :  { %4261 = vpow2.f32 %v419_v42 }
 0x517   :  { %4263 = vpow2.f32 %v417_v41 }
 0x520   :  { %v4262_v44 = vpop.eup %4261 }
 0x521   :  { %v424_v45 = vsel %vm411_vm6, %v4262_v44, 0.0  ;;  %v4264_v46 = vpop.eup %4263 }
 0x522   :  { %425 = vadd.xlane.f32.xlu1 %v424_v45  ;;  %v421_v47 = vsel %vm407_vm5, %v4264_v46, 0.0 }
 0x526   :  { %422 = vadd.xlane.f32.xlu1 %v421_v47  ;;  %v309_v47 = vld [vmem:[%s5132_s7] sm:$0xff] }
 0x537   :  { %4183 = vrot.lane.b32.xlu1 %v4621_v21, %s5156_s28 }
 0x5af   :  { %v426_v49 = vpop.xlane.xlu1 %425 }
 0x5b0   :  { %4265 = vrcp.f32 %v426_v49 }
 0x5b3   :  { %v423_v50 = vpop.xlane.xlu1 %422 }
 0x5b4   :  { %4267 = vrcp.f32 %v423_v50 }
 0x5b7   :  { %v4184_v52 = vpop.permute.xlu1 %4183 }
 0x5b8   :  { %v4186_v55 = vunpack.i.h.bf16 %v4184_v52  ;;  %v4185_v56 = vunpack.i.l.bf16 %v4184_v52 }
 0x5ba   :  { %v3997_v58 = vpack.c.bf16 %v4186_v55, %v4185_v56  ;;  %v4266_v60 = vpop.eup %4265 }
 0x5bb   :  { %v430_v63 = vmul.f32 %v4266_v60, %v4262_v44 }
 0x5bc   :  { %3999 = vmatprep.subr.msk.bf16.mxu1 %vm4661_vm9, %v3997_v58 }
 0x5bd   :  { %4002 = vmatpush3.bf16.msk.msra.mxu1 %vm4661_vm9, %v3997_v58 }
 0x5be   :  { %v4268_v61 = vpop.eup %4267  ;;  %4005 = vmatprep.subr.msk.bf16.mxu1 %vm4633_vm4, %v4003_v59 }
 0x5bf   :  { %v429_v62 = vmul.f32 %v4268_v61, %v4264_v46 }
 0x5c1   :  { %3724 = vmatprep.mubr.msk.f32.mxu1 %vm407_vm5, %v429_v62 }
 0x5c2   :  { %3725 = vmatmul.mubr.msk.f32.vlgmr.msra.gmra.mrb[4].mxu1 %vm407_vm5, %v430_v63 }
 0x5c3   :  { %3731 = vmatprep.mubr.msk.f32.mxu1 %vm319_vm3, %v521_v0 }
 0x5c6   :  { %4008 = vmatpush3.bf16.xpose.msk.msra.mxu1 %vm4633_vm4, %v4003_v59 }
 0x5cd   :  { %3732 = vmatmul.mubr.msk.f32.vlgmr.msra.gmra.mrb[6].mxu1 %vm319_vm3, %v523_v1 }
 0x695   :  { %v4677_v2 = vpop.f32.mrb[4].mxu1 }
 0x696   :  { %v4679_v3 = vpop.f32.mrb[5].mxu1 }
 0x6a0   :  { %v3733_v4 = vpop.f32.mrb[6].mxu1 }
 0x6a1   :  { %v612_v5 = vmul.f32 0.35355338, %v3733_v4  ;;  %v602_v6 = vpop.f32.mrb[7].mxu1 }
 0x6a2   :  { %v611_v7 = vmul.f32 0.35355338, %v602_v6 }
 0x6a3   :  { %v614_v8 = vadd.f32 %v612_v5, %v4651_v32 }
 0x6a4   :  { %v613_v9 = vadd.f32 %v611_v7, %v4646_v29 }
 0x6a5   :  { %v618_v10 = vsel %vm411_vm6, %v614_v8, -inf }
 0x6a6   :  { %619 = vmax.xlane.f32.xlu0 %v618_v10  ;;  %v615_v11 = vsel %vm407_vm5, %v613_v9, -inf }
 0x6a7   :  { %616 = vmax.xlane.f32.xlu1 %v615_v11 }
 0x6b8   :  { %4193 = vrot.lane.b32.xlu1 %v4621_v21, %s5151_s29 }
 0x6bc   :  { %887 = vrot.lane.b32.xlu1 %v4615_v20, %s4382_s0 }
 0x6c0   :  { %889 = vrot.lane.b32.xlu1 %v4613_v19, %s4382_s0 }
 0x6c4   :  { %4203 = vrot.lane.b32.xlu1 %v4621_v21, %s5154_s30 }
 0x6c8   :  { %1177 = vrot.lane.b32.xlu1 %v4613_v19, %s5152_s21 }
 0x733   :  { %v620_v12 = vpop.xlane.xlu0 %619 }
 0x734   :  { %v622_v13 = vsub.f32 %v614_v8, %v620_v12  ;;  %v617_v14 = vpop.xlane.xlu1 %616 }
 0x735   :  { %v621_v15 = vsub.f32 %v613_v9, %v617_v14 }
 0x736   :  { %v625_v16 = vmul.f32 1.442695, %v622_v13 }
 0x737   :  { %v623_v17 = vmul.f32 1.442695, %v621_v15 }
 0x738   :  { %v4194_v18 = vpop.permute.xlu1 %4193 }
 0x739   :  { %4269 = vpow2.f32 %v623_v17  ;;  %v4196_v22 = vunpack.i.h.bf16 %v4194_v18  ;;  %v4195_v23 = vunpack.i.l.bf16 %v4194_v18 }
 0x73a   :  { %4271 = vpow2.f32 %v625_v16 }
 0x73b   :  { %v4009_v24 = vpack.c.bf16 %v4196_v22, %v4195_v23 }
 0x73c   :  { %v888_v26 = vpop.permute.xlu1 %887 }
 0x73d   :  { %4011 = vmatprep.subr.msk.bf16.mxu1 %vm4661_vm9, %v4009_v24 }
 0x73e   :  { %4014 = vmatpush3.bf16.msk.msra.mxu1 %vm4661_vm9, %v4009_v24 }
 0x740   :  { %v890_v19 = vpop.permute.xlu1 %889 }
 0x743   :  { %v4270_v27 = vpop.eup %4269 }
 0x744   :  { %v4204_v28 = vpop.permute.xlu1 %4203  ;;  %v627_v30 = vsel %vm407_vm5, %v4270_v27, 0.0  ;;  %v4272_v31 = vpop.eup %4271 }
 0x745   :  { %v4206_v33 = vunpack.i.h.bf16 %v4204_v28  ;;  %v4205_v34 = vunpack.i.l.bf16 %v4204_v28  ;;  %628 = vadd.xlane.f32.xlu0 %v627_v30  ;;  %v630_v36 = vsel %vm411_vm6, %v4272_v31, 0.0 }
 0x747   :  { %v4027_v35 = vpack.c.bf16 %v4206_v33, %v4205_v34 }
 0x748   :  { %v1178_v44 = vpop.permute.xlu1 %1177 }
 0x749   :  { %631 = vadd.xlane.f32.xlu0 %v630_v36  ;;  %4029 = vmatprep.subr.msk.bf16.mxu0 %vm4633_vm4, %v4027_v35 }
 0x74a   :  { %4032 = vmatpush3.bf16.xpose.msk.msra.mxu0 %vm4633_vm4, %v4027_v35 }
 0x75f   :  { %4198 = vrot.lane.b32.xlu0 %v4621_v21, %s5155_s20 }
 0x763   :  { %1175 = vrot.lane.b32.xlu0 %v4615_v20, %s5152_s21  ;;  %v310_v20 = vld [vmem:[%s5132_s7 + $0x8] sm:$0xff] }
 0x764   :  { %3741 = vmatprep.subr.mxu1 %v310_v20 }
 0x7d2   :  { %v629_v37 = vpop.xlane.xlu0 %628 }
 0x7d3   :  { %4273 = vrcp.f32 %v629_v37 }
 0x7d6   :  { %v632_v38 = vpop.xlane.xlu0 %631 }
 0x7d7   :  { %4275 = vrcp.f32 %v632_v38 }
 0x7da   :  { %v4199_v39 = vpop.permute.xlu0 %4198 }
 0x7db   :  { %v4201_v51 = vunpack.i.h.bf16 %v4199_v39  ;;  %v4200_v52 = vunpack.i.l.bf16 %v4199_v39 }
 0x7dd   :  { %v4274_v40 = vpop.eup %4273  ;;  %v4015_v55 = vpack.c.bf16 %v4201_v51, %v4200_v52 }
 0x7de   :  { %v1176_v41 = vpop.permute.xlu0 %1175  ;;  %v635_v42 = vmul.f32 %v4274_v40, %v4270_v27  ;;  %v311_v40 = vld [vmem:[%s5132_s7 + $0x10] sm:$0xff] }
 0x7df   :  { %3774 = vmatprep.mubr.msk.f32.mxu0 %vm319_vm3, %v1176_v41 }
 0x7e0   :  { %3738 = vmatprep.mubr.msk.f32.mxu1 %vm407_vm5, %v635_v42  ;;  %3775 = vmatmul.mubr.msk.f32.vlgmr.msra.gmra.mrb[4].mxu0 %vm319_vm3, %v1178_v44 }
 0x7e1   :  { %v4276_v45 = vpop.eup %4275 }
 0x7e2   :  { %v636_v46 = vmul.f32 %v4276_v45, %v4272_v31 }
 0x7e4   :  { %3739 = vmatmul.mubr.msk.f32.vlgmr.msra.gmra.mrb[8].mxu1 %vm407_vm5, %v636_v46 }
 0x7e5   :  { %3742 = vmatpush3.msra.mxu1 %v310_v20 }
 0x7e6   :  { %3746 = vmatprep.subr.mxu1 %v309_v47 }
 0x8b3   :  { %v3776_v49 = vpop.f32.mrb[4].mxu0 }
 0x8b4   :  { %v1257_v50 = vpop.f32.mrb[5].mxu0  ;;  %v1267_v0 = vmul.f32 0.35355338, %v3776_v49 }
 0x8b5   :  { %v1266_v58 = vmul.f32 0.35355338, %v1257_v50 }
 0x8b6   :  { %v1269_v5 = vadd.f32 %v1267_v0, %v4651_v32 }
 0x8b7   :  { %v3740_v53 = vpop.f32.mrb[8].mxu1 }
 0x8b8   :  { %v716_v54 = vpop.f32.mrb[9].mxu1  ;;  %v1273_v6 = vsel %vm411_vm6, %v1269_v5, -inf }
 0x8b9   :  { %3743 = vmatprep.mubr.msk.f32.mxu1 %vm319_vm3, %v716_v54  ;;  %v312_v54 = vld [vmem:[%s5132_s7 + $0x18] sm:$0xff] }
 0x8ba   :  { %3744 = vmatmul.mubr.msk.f32.vlgmr.msra.gmra.mrb[10].mxu1 %vm319_vm3, %v3740_v53 }
 0x8bb   :  { %3747 = vmatpush3.msra.mxu1 %v309_v47  ;;  %3748 = vmatprep.mubr.msk.f32.mxu1 %vm319_vm3, %v4679_v3 }
 0x8bc   :  { %4017 = vmatprep.subr.msk.bf16.mxu1 %vm4633_vm4, %v4015_v55 }
 0x8c2   :  { %3749 = vmatmul.mubr.msk.f32.vlgmr.msra.gmra.mrb[10].mxu1 %vm319_vm3, %v4677_v2  ;;  %v1268_v2 = vadd.f32 %v1266_v58, %v4646_v29 }
 0x8c3   :  { %4020 = vmatpush3.bf16.xpose.msk.msra.mxu1 %vm4633_vm4, %v4015_v55  ;;  %3755 = vmatprep.mubr.msk.f32.mxu1 %vm319_vm3, %v888_v26 }
 0x8c4   :  { %v1270_v4 = vsel %vm407_vm5, %v1268_v2, -inf }
 0x8ca   :  { %3756 = vmatmul.mubr.msk.f32.vlgmr.msra.gmra.mrb[12].mxu1 %vm319_vm3, %v890_v19 }
 0x99d   :  { %v3757_v56 = vpop.f32.mrb[12].mxu1 }
 0x99e   :  { %v979_v59 = vmul.f32 0.35355338, %v3757_v56  ;;  %v969_v60 = vpop.f32.mrb[13].mxu1 }
 0x99f   :  { %v978_v61 = vmul.f32 0.35355338, %v969_v60  ;;  %v3474_v60 = vld [vmem:[%s5133_s8] ss:$0 sm:$0xff] }
 0x9a0   :  { %v981_v62 = vadd.f32 %v979_v59, %v4651_v32 }
 0x9a1   :  { %v980_v63 = vadd.f32 %v978_v61, %v4646_v29 }
 0x9a2   :  { %v985_v1 = vsel %vm411_vm6, %v981_v62, -inf }
 0x9a3   :  { %986 = vmax.xlane.f32.xlu1 %v985_v1  ;;  %v982_v3 = vsel %vm407_vm5, %v980_v63, -inf }
 0x9a4   :  { %983 = vmax.xlane.f32.xlu0 %v982_v3 }
 0x9a7   :  { %1271 = vmax.xlane.f32.xlu1 %v1270_v4 }
 0x9ab   :  { %1274 = vmax.xlane.f32.xlu1 %v1273_v6 }
 0xa30   :  { %v987_v7 = vpop.xlane.xlu1 %986 }
 0xa31   :  { %v989_v8 = vsub.f32 %v981_v62, %v987_v7  ;;  %v984_v9 = vpop.xlane.xlu0 %983 }
 0xa32   :  { %v988_v10 = vsub.f32 %v980_v63, %v984_v9 }
 0xa33   :  { %v992_v11 = vmul.f32 1.442695, %v989_v8 }
 0xa34   :  { %v990_v12 = vmul.f32 1.442695, %v988_v10  ;;  %v1272_v13 = vpop.xlane.xlu1 %1271 }
 0xa35   :  { %4277 = vpow2.f32 %v992_v11  ;;  %v1276_v14 = vsub.f32 %v1268_v2, %v1272_v13  ;;  %v1519_v13 = vld [vmem:[%s5136_s11 + $0x8] sm:$0xff] }
 0xa36   :  { %4279 = vpow2.f32 %v990_v12  ;;  %v1518_v12 = vld [vmem:[%s5136_s11] sm:$0xff] }
 0xa37   :  { %v1278_v15 = vmul.f32 1.442695, %v1276_v14  ;;  %v4039_v14 = vpack.c.bf16 %v1519_v13, %v1518_v12 }
 0xa38   :  { %v1275_v16 = vpop.xlane.xlu1 %1274 }
 0xa39   :  { %4281 = vpow2.f32 %v1278_v15  ;;  %v1277_v17 = vsub.f32 %v1269_v5, %v1275_v16  ;;  %4040 = vmatprep.subr.bf16.mxu0 %v4039_v14  ;;  %v1520_v15 = vld [vmem:[%s5136_s11 + $0x10] sm:$0xff]  ;;  %v1521_v16 = vld [vmem:[%s5136_s11 + $0x18] sm:$0xff] }
 0xa3a   :  { %4042 = vmatpush3.bf16.msra.mxu0 %v4039_v14 }
 0xa3b   :  { %v1280_v18 = vmul.f32 1.442695, %v1277_v17  ;;  %v4043_v17 = vpack.c.bf16 %v1521_v16, %v1520_v15 }
 0xa3d   :  { %4283 = vpow2.f32 %v1280_v18  ;;  %4044 = vmatprep.subr.bf16.mxu0 %v4043_v17 }
 0xa3e   :  { %4046 = vmatpush3.bf16.msra.mxu0 %v4043_v17 }
 0xa3f   :  { %v4278_v22 = vpop.eup %4277 }
 0xa40   :  { %v997_v23 = vsel %vm411_vm6, %v4278_v22, 0.0  ;;  %v4280_v24 = vpop.eup %4279 }
 0xa41   :  { %998 = vadd.xlane.f32.xlu0 %v997_v23  ;;  %v994_v27 = vsel %vm407_vm5, %v4280_v24, 0.0 }
 0xa43   :  { %v4282_v26 = vpop.eup %4281 }
 0xa44   :  { %v1282_v19 = vsel %vm407_vm5, %v4282_v26, 0.0 }
 0xa45   :  { %1283 = vadd.xlane.f32.xlu1 %v1282_v19  ;;  %995 = vadd.xlane.f32.xlu0 %v994_v27 }
 0xa47   :  { %v4284_v28 = vpop.eup %4283 }
 0xa48   :  { %v1285_v30 = vsel %vm411_vm6, %v4284_v28, 0.0 }
 0xa49   :  { %1286 = vadd.xlane.f32.xlu1 %v1285_v30 }
 0xa5a   :  { %4213 = vrot.lane.b32.xlu1 %v4621_v21, %s5149_s27  ;;  %s5174_s27 = smov 48  }
 0xa5b   :  { %4208 = vrot.lane.b32.xlu0 %v4621_v21, %s5150_s1 }
 0xace   :  { %v999_v31 = vpop.xlane.xlu0 %998 }
 0xacf   :  { %4285 = vrcp.f32 %v999_v31  ;;  %v3476_v31 = vld [vmem:[%s5135_s10] ss:$0 sm:$0xff] }
 0xad2   :  { %v1284_v33 = vpop.xlane.xlu1 %1283  ;;  %v996_v34 = vpop.xlane.xlu0 %995 }
 0xad3   :  { %4287 = vrcp.f32 %v996_v34 }
 0xad4   :  { %4289 = vrcp.f32 %v1284_v33 }
 0xad6   :  { %v1287_v35 = vpop.xlane.xlu1 %1286  ;;  %v4209_v36 = vpop.permute.xlu0 %4208 }
 0xad7   :  { %v4211_v37 = vunpack.i.h.bf16 %v4209_v36  ;;  %v4210_v38 = vunpack.i.l.bf16 %v4209_v36  ;;  %4291 = vrcp.f32 %v1287_v35 }
 0xad9   :  { %v4021_v39 = vpack.c.bf16 %v4211_v37, %v4210_v38  ;;  %v4286_v21 = vpop.eup %4285 }
 0xada   :  { %v4214_v41 = vpop.permute.xlu1 %4213  ;;  %v1003_v20 = vmul.f32 %v4286_v21, %v4278_v22  ;;  %v1630_v21 = vld [vmem:[%s5138_s13 + $0x10] sm:$0xff] }
 0xadb   :  { %4023 = vmatprep.subr.msk.bf16.mxu1 %vm4661_vm9, %v4021_v39  ;;  %v4216_v44 = vunpack.i.h.bf16 %v4214_v41  ;;  %v4215_v45 = vunpack.i.l.bf16 %v4214_v41 }
 0xadc   :  { %4026 = vmatpush3.bf16.msk.msra.mxu1 %vm4661_vm9, %v4021_v39  ;;  %v1628_v39 = vld [vmem:[%s5138_s13] sm:$0xff] }
 0xadd   :  { %3765 = vmatprep.subr.mxu1 %v311_v40  ;;  %v4288_v42 = vpop.eup %4287  ;;  %v4033_v47 = vpack.c.bf16 %v4216_v44, %v4215_v45  ;;  %v1632_v45 = vld [vmem:[%s5138_s13 + $0x20] sm:$0xff] }
 0xade   :  { %v1002_v46 = vmul.f32 %v4288_v42, %v4280_v24  ;;  %v4290_v49 = vpop.eup %4289  ;;  %v1631_v42 = vld [vmem:[%s5138_s13 + $0x18] sm:$0xff] }
 0xadf   :  { %v1290_v53 = vmul.f32 %v4290_v49, %v4282_v26  ;;  %v4051_v44 = vpack.c.bf16 %v1631_v42, %v1630_v21  ;;  %v1635_v49 = vld [vmem:[%s5138_s13 + $0x38] sm:$0xff] }
 0xae0   :  { %3762 = vmatprep.mubr.msk.f32.mxu1 %vm407_vm5, %v1002_v46  ;;  %v1633_v46 = vld [vmem:[%s5138_s13 + $0x28] sm:$0xff] }
 0xae1   :  { %3763 = vmatmul.mubr.msk.f32.vlgmr.msra.gmra.mrb[14].mxu1 %vm407_vm5, %v1003_v20  ;;  %v4292_v52 = vpop.eup %4291  ;;  %v4055_v20 = vpack.c.bf16 %v1633_v46, %v1632_v45  ;;  %v3485_v46 = vld [vmem:[%s5129_s4 + $0x1] ss:$0 sm:$0xff]  ;;  %s5169_s4 = smov 64  }
 0xae2   :  { %3766 = vmatpush3.msra.mxu1 %v311_v40  ;;  %v1291_v55 = vmul.f32 %v4292_v52, %v4284_v28  ;;  %v3475_v28 = vld [vmem:[%s5134_s9] ss:$0 sm:$0xff]  ;;  %v1629_v40 = vld [vmem:[%s5138_s13 + $0x8] sm:$0xff] }
 0xae3   :  { %4035 = vmatprep.subr.msk.bf16.mxu1 %vm4661_vm9, %v4033_v47  ;;  %v4047_v41 = vpack.c.bf16 %v1629_v40, %v1628_v39 }
 0xbb4   :  { %v3764_v50 = vpop.f32.mrb[14].mxu1 }
 0xbb5   :  { %v1083_v51 = vpop.f32.mrb[15].mxu1 }
 0xbb6   :  { %3767 = vmatprep.mubr.msk.f32.mxu1 %vm319_vm3, %v1083_v51  ;;  %v3477_v51 = vld [vmem:[%s5137_s12] ss:$0 sm:$0xff] }
 0xbb7   :  { %3768 = vmatmul.mubr.msk.f32.vlgmr.msra.gmra.mrb[10].mxu1 %vm319_vm3, %v3764_v50 }
 0xbb8   :  { %4038 = vmatpush3.bf16.msk.msra.mxu1 %vm4661_vm9, %v4033_v47  ;;  %3781 = vmatprep.mubr.msk.f32.mxu1 %vm407_vm5, %v1290_v53  ;;  %v1634_v47 = vld [vmem:[%s5138_s13 + $0x30] sm:$0xff] }
 0xbb9   :  { %3784 = vmatprep.subr.mxu1 %v312_v54  ;;  %v4059_v50 = vpack.c.bf16 %v1635_v49, %v1634_v47  ;;  %v3486_v47 = vld [vmem:[%s5130_s5 + $0x1] ss:$0 sm:$0xff]  ;;  %s5170_s5 = smov 80  }
 0xbbb   :  { %3782 = vmatmul.mubr.msk.f32.vlgmr.msra.gmra.mrb[16].mxu1 %vm407_vm5, %v1291_v55 }
 0xbbc   :  { %3785 = vmatpush3.msra.mxu1 %v312_v54 }
 0xbbd   :  { %4048 = vmatprep.subr.bf16.mxu1 %v4047_v41 }
 0xc8e   :  { %v3783_v56 = vpop.f32.mrb[16].mxu1 }
 0xc8f   :  { %v1371_v58 = vpop.f32.mrb[17].mxu1 }
 0xc90   :  { %3786 = vmatprep.mubr.msk.f32.mxu1 %vm319_vm3, %v1371_v58 }
 0xc91   :  { %3787 = vmatmul.mubr.msk.f32.vlgmr.msra.gmra.mrb[10].mxu1 %vm319_vm3, %v3783_v56 }
 0xc92   :  { %4050 = vmatpush3.bf16.msra.mxu1 %v4047_v41 }
 0xc93   :  { %4052 = vmatprep.subr.bf16.mxu1 %v4051_v44 }
 0xc96   :  { %4054 = vmatpush3.bf16.msra.mxu1 %v4051_v44 }
 0xc97   :  { %4056 = vmatprep.subr.bf16.mxu1 %v4055_v20 }
 0xc9a   :  { %4058 = vmatpush3.bf16.msra.mxu1 %v4055_v20 }
 0xc9b   :  { %4060 = vmatprep.subr.bf16.mxu1 %v4059_v50 }
 0xc9e   :  { %4062 = vmatpush3.bf16.msra.mxu1 %v4059_v50 }
 0xd64   :  { %v3788_v59 = vpop.f32.mrb[10].mxu1 }
 0xd65   :  { %v1464_v61 = vadd.f32 %v3788_v59, %v4585_v48  ;;  %v1452_v62 = vpop.f32.mrb[11].mxu1 }
 0xd66   :  { %v1463_v63 = vadd.f32 %v1452_v62, %v4578_v43 }
 0xd67   :  { %v4774_v0 = vadd.f32 %v3474_v60, %v1464_v61 }
 0xd68   :  { %v4776_v1 = vadd.f32 %v3474_v60, %v1463_v63 }
 0xd69   :  { %v1479_v2 = vsel %vm183_vm2, %v4774_v0, 0.0 }
 0xd6a   :  { %1480 = vadd.xlane.f32.xlu1 %v1479_v2  ;;  %v1476_v3 = vsel %vm179_vm1, %v4776_v1, 0.0 }
 0xd6b   :  { %1477 = vadd.xlane.f32.xlu0 %v1476_v3 }
 0xdf7   :  { %v1481_v4 = vpop.xlane.xlu1 %1480 }
 0xdf8   :  { %v1483_v5 = vmul.f32 0.03125, %v1481_v4  ;;  %v1478_v6 = vpop.xlane.xlu0 %1477 }
 0xdf9   :  { %v1482_v7 = vmul.f32 0.03125, %v1478_v6 }
 0xdfa   :  { %v1485_v48 = vsub.f32 %v4774_v0, %v1483_v5 }
 0xdfb   :  { %v1484_v43 = vsub.f32 %v4776_v1, %v1482_v7 }
 0xdfc   :  { %v1487_v10 = vmul.f32 %v1485_v48, %v1485_v48 }
 0xdfd   :  { %v1486_v8 = vmul.f32 %v1484_v43, %v1484_v43 }
 0xdfe   :  { %v1491_v11 = vsel %vm183_vm2, %v1487_v10, 0.0 }
 0xdff   :  { %v1488_v9 = vsel %vm179_vm1, %v1486_v8, 0.0 }
 0xe00   :  { %1489 = vadd.xlane.f32.xlu0 %v1488_v9 }
 0xe04   :  { %1492 = vadd.xlane.f32.xlu0 %v1491_v11  ;;  %v3480_v11 = vld [vmem:[%s5139_s14] ss:$0 sm:$0xff] }
 0xe8d   :  { %v1490_v18 = vpop.xlane.xlu0 %1489 }
 0xe8e   :  { %v1494_v22 = vmul.f32 0.03125, %v1490_v18 }
 0xe90   :  { %v1496_v23 = vadd.f32 1e-05, %v1494_v22 }
 0xe91   :  { %v1493_v24 = vpop.xlane.xlu0 %1492 }
 0xe92   :  { %4293 = vrsqrt.f32 %v1496_v23  ;;  %v1495_v26 = vmul.f32 0.03125, %v1493_v24 }
 0xe94   :  { %v1497_v19 = vadd.f32 1e-05, %v1495_v26 }
 0xe96   :  { %4295 = vrsqrt.f32 %v1497_v19 }
 0xe9c   :  { %v4294_v27 = vpop.eup %4293 }
 0xe9d   :  { %v1500_v30 = vmul.f32 %v4294_v27, %v1484_v43 }
 0xe9f   :  { %v1508_v33 = vmul.f32 %v3475_v28, %v1500_v30 }
 0xea0   :  { %v4296_v34 = vpop.eup %4295 }
 0xea1   :  { %v1501_v35 = vmul.f32 %v4296_v34, %v1485_v48  ;;  %v1516_v36 = vadd.f32 %v3476_v31, %v1508_v33  ;;  %v3487_v33 = vld [vmem:[%s5131_s6 + $0x20] sm:$0xff]  ;;  %v3488_v34 = vld [vmem:[%s5131_s6 + $0x28] sm:$0xff] }
 0xea3   :  { %v1509_v37 = vmul.f32 %v3475_v28, %v1501_v35  ;;  %3797 = vmatprep.mubr.msk.f32.mxu0 %vm179_vm1, %v1516_v36  ;;  %v4063_v35 = vpack.c.bf16 %v3488_v34, %v3487_v33  ;;  %v3489_v36 = vld [vmem:[%s5131_s6 + $0x30] sm:$0xff] }
 0xea5   :  { %v1517_v38 = vadd.f32 %v3476_v31, %v1509_v37  ;;  %4064 = vmatprep.subr.bf16.mxu0 %v4063_v35  ;;  %v3490_v37 = vld [vmem:[%s5131_s6 + $0x38] sm:$0xff]  ;;  %s5171_s6 = smov 72  }
 0xea7   :  { %3798 = vmatmul.mubr.msk.f32.vlgmr.msra.gmra.mrb[6].mxu0 %vm179_vm1, %v1517_v38  ;;  %v4067_v38 = vpack.c.bf16 %v3490_v37, %v3489_v36 }
 0xea8   :  { %4066 = vmatpush3.bf16.msra.mxu0 %v4063_v35 }
 0xea9   :  { %4068 = vmatprep.subr.bf16.mxu0 %v4067_v38 }
 0xeac   :  { %4070 = vmatpush3.bf16.msra.mxu0 %v4067_v38 }
 0xf7a   :  { %v3799_v52 = vpop.f32.mrb[6].mxu0 }
 0xf7b   :  { %v1607_v53 = vadd.f32 %v3799_v52, %v3477_v51  ;;  %v1601_v54 = vpop.f32.mrb[7].mxu0 }
 0xf7c   :  { %v1602_v55 = vadd.f32 %v3477_v51, %v1601_v54 }
 0xf7d   :  { %v1611_v56 = vmul.f32 0.044715, %v1607_v53  ;;  %v1621_v8 = vmul.f32 0.5, %v1607_v53 }
 0xf7e   :  { %v1610_v58 = vmul.f32 0.044715, %v1602_v55  ;;  %v1620_v48 = vmul.f32 0.5, %v1602_v55 }
 0xf7f   :  { %v1613_v59 = vmul.f32 %v1611_v56, %v1607_v53 }
 0xf80   :  { %v1612_v60 = vmul.f32 %v1610_v58, %v1602_v55 }
 0xf81   :  { %v1615_v61 = vmul.f32 %v1613_v59, %v1607_v53 }
 0xf82   :  { %v1614_v62 = vmul.f32 %v1612_v60, %v1602_v55 }
 0xf83   :  { %v1617_v63 = vadd.f32 %v1615_v61, %v1607_v53 }
 0xf84   :  { %v1616_v2 = vadd.f32 %v1614_v62, %v1602_v55 }
 0xf85   :  { %v1619_v3 = vmul.f32 0.7978846, %v1617_v63 }
 0xf86   :  { %v1618_v4 = vmul.f32 0.7978846, %v1616_v2 }
 0xf87   :  { %4297 = vtanh.f32 %v1619_v3 }
 0xf88   :  { %4299 = vtanh.f32 %v1618_v4 }
 0xf91   :  { %v4298_v5 = vpop.eup %4297 }
 0xf92   :  { %v4300_v6 = vpop.eup %4299  ;;  %v1625_v7 = vadd.f32 1.0, %v4298_v5 }
 0xf93   :  { %v1624_v43 = vadd.f32 1.0, %v4300_v6 }
 0xf94   :  { %v1627_v10 = vmul.f32 %v1625_v7, %v1621_v8 }
 0xf95   :  { %v1626_v9 = vmul.f32 %v1624_v43, %v1620_v48 }
 0xf97   :  { %3816 = vmatprep.mubr.msk.f32.mxu1 %vm93_vm0, %v1626_v9 }
 0xf98   :  { %3817 = vmatmul.mubr.msk.f32.vlgmr.msra.gmra.mrb[18].mxu1 %vm93_vm0, %v1627_v10 }
0x106b   :  { %v3818_v12 = vpop.f32.mrb[18].mxu1 }
0x106c   :  { %v1715_v13 = vpop.f32.mrb[19].mxu1  ;;  %v1721_v14 = vadd.f32 %v3818_v12, %v3480_v11 }
0x106d   :  { %v1716_v15 = vadd.f32 %v3480_v11, %v1715_v13 }
0x106e   :  { %v4842_v17 = vadd.f32 %v1721_v14, %v4774_v0 }
0x106f   :  { %v4839_v16 = vadd.f32 %v1716_v15, %v4776_v1 }
0x1070   :  { %v1733_v22 = vsel %vm183_vm2, %v4842_v17, 0.0 }
0x1071   :  { %v1730_v18 = vsel %vm179_vm1, %v4839_v16, 0.0 }
0x1072   :  { %1731 = vadd.xlane.f32.xlu0 %v1730_v18 }
0x1076   :  { %1734 = vadd.xlane.f32.xlu0 %v1733_v22 }
0x10ff   :  { %v1732_v23 = vpop.xlane.xlu0 %1731 }
0x1100   :  { %v1736_v24 = vmul.f32 0.03125, %v1732_v23 }
0x1102   :  { %v1738_v26 = vsub.f32 %v4839_v16, %v1736_v24 }
0x1103   :  { %v1735_v19 = vpop.xlane.xlu0 %1734 }
0x1104   :  { %v1737_v27 = vmul.f32 0.03125, %v1735_v19  ;;  %v1740_v28 = vmul.f32 %v1738_v26, %v1738_v26 }
0x1106   :  { %v1739_v1 = vsub.f32 %v4842_v17, %v1737_v27  ;;  %v1742_v0 = vsel %vm179_vm1, %v1740_v28, 0.0 }
0x1107   :  { %1743 = vadd.xlane.f32.xlu0 %v1742_v0 }
0x1108   :  { %v1741_v30 = vmul.f32 %v1739_v1, %v1739_v1 }
0x110a   :  { %v1745_v31 = vsel %vm183_vm2, %v1741_v30, 0.0 }
0x110b   :  { %1746 = vadd.xlane.f32.xlu1 %v1745_v31 }
0x1194   :  { %v1744_v39 = vpop.xlane.xlu0 %1743 }
0x1195   :  { %v1748_v40 = vmul.f32 0.03125, %v1744_v39 }
0x1197   :  { %v1750_v41 = vadd.f32 1e-05, %v1748_v40 }
0x1198   :  { %v1747_v21 = vpop.xlane.xlu1 %1746 }
0x1199   :  { %4301 = vrsqrt.f32 %v1750_v41  ;;  %v1749_v42 = vmul.f32 0.03125, %v1747_v21 }
0x119b   :  { %v1751_v44 = vadd.f32 1e-05, %v1749_v42 }
0x119d   :  { %4303 = vrsqrt.f32 %v1751_v44 }
0x11a3   :  { %v4302_v45 = vpop.eup %4301 }
0x11a4   :  { %v1754_v20 = vmul.f32 %v4302_v45, %v1738_v26 }
0x11a6   :  { %v1762_v49 = vmul.f32 %v3485_v46, %v1754_v20 }
0x11a7   :  { %v4304_v50 = vpop.eup %4303 }
0x11a8   :  { %v1755_v51 = vmul.f32 %v4304_v50, %v1739_v1  ;;  %v1770_v52 = vadd.f32 %v3486_v47, %v1762_v49 }
0x11aa   :  { %v1763_v53 = vmul.f32 %v3485_v46, %v1755_v51  ;;  %3827 = vmatprep.mubr.msk.f32.mxu0 %vm179_vm1, %v1770_v52 }
0x11ac   :  { %v1771_v54 = vadd.f32 %v3486_v47, %v1763_v53 }
0x11ae   :  { %3828 = vmatmul.mubr.msk.f32.vlgmr.msra.gmra.mrb[8].mxu0 %vm179_vm1, %v1771_v54 }
0x1281   :  { %v4872_v55 = vpop.f32.mrb[8].mxu0 }
0x1282   :  { %v4874_v56 = vpop.f32.mrb[9].mxu0 }
0x1283   :  { %3834 = vmatprep.mubr.msk.f32.mxu0 %vm319_vm3, %v4874_v56  ;;  %v4880_v58 = vpack.i.bf16 %v4872_v55, %v4874_v56 }
0x1285   :  { %4218 = vrot.lane.b32.xlu0 %v4880_v58, %s4376_s2  ;;  %s5172_s2 = smov 104  }
0x1289   :  { %4228 = vrot.lane.b32.xlu0 %v4880_v58, %s4377_s23  ;;  %s5173_s23 = smov 56  }
0x128d   :  { %2066 = vrot.lane.b32.xlu0 %v4874_v56, %s4378_s24 }
0x1291   :  { %2068 = vrot.lane.b32.xlu0 %v4872_v55, %s4378_s24 }
0x1295   :  { %2433 = vrot.lane.b32.xlu0 %v4874_v56, %s4382_s0 }
0x12f7   :  { %v4219_v59 = vpop.permute.xlu0 %4218 }
0x12f8   :  { %v4221_v60 = vunpack.i.h.bf16 %v4219_v59  ;;  %v4220_v61 = vunpack.i.l.bf16 %v4219_v59 }
0x12fa   :  { %v4071_v62 = vpack.c.bf16 %v4221_v60, %v4220_v61 }
0x12fb   :  { %v4229_v24 = vpop.permute.xlu0 %4228 }
0x12fc   :  { %4073 = vmatprep.subr.msk.bf16.mxu0 %vm4633_vm4, %v4071_v62  ;;  %v4231_v19 = vunpack.i.h.bf16 %v4229_v24  ;;  %v4230_v27 = vunpack.i.l.bf16 %v4229_v24 }
0x12fd   :  { %4076 = vmatpush3.bf16.xpose.msk.msra.mxu0 %vm4633_vm4, %v4071_v62 }
0x12fe   :  { %v4083_v30 = vpack.c.bf16 %v4231_v19, %v4230_v27 }
0x12ff   :  { %v2067_v37 = vpop.permute.xlu0 %2066 }
0x1303   :  { %v2069_v41 = vpop.permute.xlu0 %2068 }
0x1304   :  { %3835 = vmatmul.mubr.msk.f32.vlgmr.msra.gmra.mrb[10].mxu0 %vm319_vm3, %v4872_v55 }
0x1307   :  { %v2434_v21 = vpop.permute.xlu0 %2433 }
0x13d7   :  { %v3836_v63 = vpop.f32.mrb[10].mxu0 }
0x13d8   :  { %v1943_v2 = vpop.f32.mrb[11].mxu0  ;;  %v1953_v3 = vmul.f32 0.35355338, %v3836_v63 }
0x13d9   :  { %v1952_v4 = vmul.f32 0.35355338, %v1943_v2 }
0x13da   :  { %v1955_v7 = vadd.f32 %v1953_v3, %v4651_v32 }
0x13db   :  { %v1954_v5 = vadd.f32 %v1952_v4, %v4646_v29 }
0x13dc   :  { %v1959_v48 = vsel %vm411_vm6, %v1955_v7, -inf }
0x13dd   :  { %v1956_v6 = vsel %vm407_vm5, %v1954_v5, -inf }
0x13de   :  { %1957 = vmax.xlane.f32.xlu1 %v1956_v6 }
0x13e2   :  { %1960 = vmax.xlane.f32.xlu1 %v1959_v48 }
0x146b   :  { %v1958_v43 = vpop.xlane.xlu1 %1957 }
0x146c   :  { %v1962_v8 = vsub.f32 %v1954_v5, %v1958_v43 }
0x146e   :  { %v1964_v11 = vmul.f32 1.442695, %v1962_v8 }
0x146f   :  { %v1961_v9 = vpop.xlane.xlu1 %1960 }
0x1470   :  { %v1963_v10 = vsub.f32 %v1955_v7, %v1961_v9 }
0x1472   :  { %v1966_v12 = vmul.f32 1.442695, %v1963_v10 }
0x1474   :  { %4305 = vpow2.f32 %v1966_v12 }
0x1475   :  { %4307 = vpow2.f32 %v1964_v11 }
0x147e   :  { %v4306_v13 = vpop.eup %4305 }
0x147f   :  { %v1971_v14 = vsel %vm411_vm6, %v4306_v13, 0.0  ;;  %v4308_v15 = vpop.eup %4307 }
0x1480   :  { %1972 = vadd.xlane.f32.xlu1 %v1971_v14  ;;  %v1968_v18 = vsel %vm407_vm5, %v4308_v15, 0.0 }
0x1484   :  { %1969 = vadd.xlane.f32.xlu1 %v1968_v18 }
0x1495   :  { %4223 = vrot.lane.b32.xlu1 %v4880_v58, %s5169_s4 }
0x1499   :  { %4233 = vrot.lane.b32.xlu1 %v4880_v58, %s5170_s5 }
0x149d   :  { %2435 = vrot.lane.b32.xlu1 %v4872_v55, %s4382_s0 }
0x150d   :  { %v1973_v22 = vpop.xlane.xlu1 %1972 }
0x150e   :  { %4309 = vrcp.f32 %v1973_v22 }
0x1511   :  { %v1970_v23 = vpop.xlane.xlu1 %1969 }
0x1512   :  { %4311 = vrcp.f32 %v1970_v23 }
0x1515   :  { %v4224_v26 = vpop.permute.xlu1 %4223 }
0x1516   :  { %v4226_v28 = vunpack.i.h.bf16 %v4224_v26  ;;  %v4225_v1 = vunpack.i.l.bf16 %v4224_v26 }
0x1518   :  { %v4077_v0 = vpack.c.bf16 %v4226_v28, %v4225_v1  ;;  %v4310_v31 = vpop.eup %4309 }
0x1519   :  { %v4234_v34 = vpop.permute.xlu1 %4233  ;;  %v1977_v36 = vmul.f32 %v4310_v31, %v4306_v13 }
0x151a   :  { %4079 = vmatprep.subr.msk.bf16.mxu1 %vm4661_vm9, %v4077_v0  ;;  %v4236_v38 = vunpack.i.h.bf16 %v4234_v34  ;;  %v4235_v39 = vunpack.i.l.bf16 %v4234_v34 }
0x151b   :  { %4082 = vmatpush3.bf16.msk.msra.mxu1 %vm4661_vm9, %v4077_v0 }
0x151c   :  { %v4312_v33 = vpop.eup %4311  ;;  %4085 = vmatprep.subr.msk.bf16.mxu1 %vm4633_vm4, %v4083_v30  ;;  %v4095_v40 = vpack.c.bf16 %v4236_v38, %v4235_v39 }
0x151d   :  { %v1976_v35 = vmul.f32 %v4312_v33, %v4308_v15  ;;  %v2436_v42 = vpop.permute.xlu1 %2435 }
0x151f   :  { %3841 = vmatprep.mubr.msk.f32.mxu1 %vm407_vm5, %v1976_v35 }
0x1520   :  { %3842 = vmatmul.mubr.msk.f32.vlgmr.msra.gmra.mrb[20].mxu1 %vm407_vm5, %v1977_v36 }
0x1521   :  { %3848 = vmatprep.mubr.msk.f32.mxu1 %vm319_vm3, %v2067_v37 }
0x1524   :  { %4088 = vmatpush3.bf16.xpose.msk.msra.mxu1 %vm4633_vm4, %v4083_v30 }
0x1525   :  { %4097 = vmatprep.subr.msk.bf16.mxu1 %vm4633_vm4, %v4095_v40 }
0x152b   :  { %3849 = vmatmul.mubr.msk.f32.vlgmr.msra.gmra.mrb[22].mxu1 %vm319_vm3, %v2069_v41 }
0x152c   :  { %4100 = vmatpush3.bf16.xpose.msk.msra.mxu1 %vm4633_vm4, %v4095_v40  ;;  %3872 = vmatprep.mubr.msk.f32.mxu1 %vm319_vm3, %v2434_v21 }
0x1533   :  { %3873 = vmatmul.mubr.msk.f32.vlgmr.msra.gmra.mrb[24].mxu1 %vm319_vm3, %v2436_v42 }
0x15f3   :  { %v4928_v44 = vpop.f32.mrb[20].mxu1 }
0x15f4   :  { %v4930_v45 = vpop.f32.mrb[21].mxu1 }
0x15fe   :  { %v3850_v46 = vpop.f32.mrb[22].mxu1 }
0x15ff   :  { %v2158_v20 = vmul.f32 0.35355338, %v3850_v46  ;;  %v2148_v47 = vpop.f32.mrb[23].mxu1 }
0x1600   :  { %v2157_v49 = vmul.f32 0.35355338, %v2148_v47 }
0x1601   :  { %v2160_v50 = vadd.f32 %v2158_v20, %v4651_v32  ;;  %v4350_v20 = vld [vmem:[%s5166_s3 + $0x8] sm:$0x3]  ;;  %s5175_s3 = smov 40  }
0x1602   :  { %v2159_v51 = vadd.f32 %v2157_v49, %v4646_v29 }
0x1603   :  { %v2164_v52 = vsel %vm411_vm6, %v2160_v50, -inf }
0x1604   :  { %2165 = vmax.xlane.f32.xlu1 %v2164_v52  ;;  %v2161_v53 = vsel %vm407_vm5, %v2159_v51, -inf }
0x1605   :  { %2162 = vmax.xlane.f32.xlu0 %v2161_v53 }
0x1606   :  { %v3874_v54 = vpop.f32.mrb[24].mxu1 }
0x1607   :  { %v2515_v59 = vpop.f32.mrb[25].mxu1  ;;  %v2525_v60 = vmul.f32 0.35355338, %v3874_v54 }
0x1608   :  { %v2524_v14 = vmul.f32 0.35355338, %v2515_v59 }
0x1609   :  { %v2527_v29 = vadd.f32 %v2525_v60, %v4651_v32 }
0x160a   :  { %v2526_v15 = vadd.f32 %v4349_v25, %v2524_v14 }
0x160b   :  { %v2531_v61 = vsel %vm411_vm6, %v2527_v29, -inf }
0x160c   :  { %v2528_v18 = vsel %vm407_vm5, %v2526_v15, -inf }
0x1615   :  { %4243 = vrot.lane.b32.xlu1 %v4880_v58, %s5171_s6 }
0x1619   :  { %2721 = vrot.lane.b32.xlu1 %v4874_v56, %s5172_s2 }
0x161d   :  { %2723 = vrot.lane.b32.xlu1 %v4872_v55, %s5172_s2 }
0x1641   :  { %2532 = vmax.xlane.f32.xlu1 %v2531_v61 }
0x1691   :  { %v2166_v62 = vpop.xlane.xlu1 %2165 }
0x1692   :  { %v2168_v63 = vsub.f32 %v2160_v50, %v2166_v62  ;;  %v2163_v2 = vpop.xlane.xlu0 %2162  ;;  %v3494_v50 = vld [vmem:[%s5132_s7 + $0x28] sm:$0xff] }
0x1693   :  { %v2167_v3 = vsub.f32 %v2159_v51, %v2163_v2  ;;  %v3493_v51 = vld [vmem:[%s5132_s7 + $0x20] sm:$0xff] }
0x1694   :  { %v2171_v4 = vmul.f32 1.442695, %v2168_v63 }
0x1695   :  { %v2169_v5 = vmul.f32 1.442695, %v2167_v3  ;;  %v4244_v6 = vpop.permute.xlu1 %4243 }
0x1696   :  { %4313 = vpow2.f32 %v2171_v4  ;;  %v4246_v7 = vunpack.i.h.bf16 %v4244_v6  ;;  %v4245_v48 = vunpack.i.l.bf16 %v4244_v6 }
0x1697   :  { %4315 = vpow2.f32 %v2169_v5 }
0x1698   :  { %v4107_v56 = vpack.c.bf16 %v4246_v7, %v4245_v48 }
0x1699   :  { %v2722_v43 = vpop.permute.xlu1 %2721 }
0x169a   :  { %4109 = vmatprep.subr.msk.bf16.mxu1 %vm4633_vm4, %v4107_v56  ;;  %3891 = vmatprep.mubr.msk.f32.mxu1 %vm319_vm3, %v2722_v43 }
0x169b   :  { %4112 = vmatpush3.bf16.xpose.msk.msra.mxu1 %vm4633_vm4, %v4107_v56 }
0x169d   :  { %v2724_v55 = vpop.permute.xlu1 %2723 }
0x16a0   :  { %v4314_v32 = vpop.eup %4313 }
0x16a1   :  { %v2176_v8 = vsel %vm411_vm6, %v4314_v32, 0.0  ;;  %v4316_v9 = vpop.eup %4315 }
0x16a2   :  { %3892 = vmatmul.mubr.msk.f32.vlgmr.msra.gmra.mrb[26].mxu1 %vm319_vm3, %v2724_v55  ;;  %2177 = vadd.xlane.f32.xlu0 %v2176_v8  ;;  %v2173_v10 = vsel %vm407_vm5, %v4316_v9, 0.0 }
0x16a6   :  { %2174 = vadd.xlane.f32.xlu0 %v2173_v10 }
0x16bc   :  { %4238 = vrot.lane.b32.xlu0 %v4880_v58, %s5173_s23 }
0x16ce   :  { %v2533_v11 = vpop.xlane.xlu1 %2532 }
0x16cf   :  { %v2535_v12 = vsub.f32 %v2527_v29, %v2533_v11 }
0x16d1   :  { %v2538_v13 = vmul.f32 1.442695, %v2535_v12 }
0x16d3   :  { %4317 = vpow2.f32 %v2538_v13 }
0x16db   :  { %2529 = vmax.xlane.f32.xlu0 %v2528_v18 }
0x16dd   :  { %v4958_v22 = vpop.eup %4317 }
0x16de   :  { %v2543_v23 = vsel %vm411_vm6, %v4958_v22, 0.0 }
0x16df   :  { %2544 = vadd.xlane.f32.xlu0 %v2543_v23  ;;  %v3496_v23 = vld [vmem:[%s5132_s7 + $0x38] sm:$0xff] }
0x172f   :  { %v2178_v24 = vpop.xlane.xlu0 %2177 }
0x1730   :  { %4319 = vrcp.f32 %v2178_v24 }
0x1733   :  { %v2175_v26 = vpop.xlane.xlu0 %2174 }
0x1734   :  { %4321 = vrcp.f32 %v2175_v26 }
0x1737   :  { %v4239_v19 = vpop.permute.xlu0 %4238 }
0x1738   :  { %v4241_v27 = vunpack.i.h.bf16 %v4239_v19  ;;  %v4240_v28 = vunpack.i.l.bf16 %v4239_v19 }
0x173a   :  { %v4089_v1 = vpack.c.bf16 %v4241_v27, %v4240_v28  ;;  %v4320_v0 = vpop.eup %4319  ;;  %v3534_v28 = vld [vmem:[%s5133_s8 + $0x1] ss:$0 sm:$0xff] }
0x173b   :  { %v2182_v33 = vmul.f32 %v4320_v0, %v4314_v32 }
0x173c   :  { %4091 = vmatprep.subr.msk.bf16.mxu0 %vm4661_vm9, %v4089_v1 }
0x173d   :  { %4094 = vmatpush3.bf16.msk.msra.mxu0 %vm4661_vm9, %v4089_v1 }
0x173e   :  { %v4322_v30 = vpop.eup %4321  ;;  %3858 = vmatprep.subr.mxu0 %v3494_v50 }
0x173f   :  { %v2181_v31 = vmul.f32 %v4322_v30, %v4316_v9  ;;  %v3495_v9 = vld [vmem:[%s5132_s7 + $0x30] sm:$0xff] }
0x1741   :  { %3855 = vmatprep.mubr.msk.f32.mxu0 %vm407_vm5, %v2181_v31 }
0x1742   :  { %3856 = vmatmul.mubr.msk.f32.vlgmr.msra.gmra.mrb[12].mxu0 %vm407_vm5, %v2182_v33 }
0x1743   :  { %3859 = vmatpush3.msra.mxu0 %v3494_v50 }
0x1744   :  { %3863 = vmatprep.subr.mxu0 %v3493_v51 }
0x1768   :  { %v2530_v34 = vpop.xlane.xlu0 %2529 }
0x1769   :  { %v2534_v35 = vsub.f32 %v2526_v15, %v2530_v34 }
0x176b   :  { %v2536_v36 = vmul.f32 1.442695, %v2534_v35 }
0x176c   :  { %v2545_v52 = vpop.xlane.xlu0 %2544 }
0x176d   :  { %4323 = vpow2.f32 %v2536_v36 }
0x1775   :  { %v3893_v37 = vpop.f32.mrb[26].mxu1 }
0x1776   :  { %v2803_v38 = vpop.f32.mrb[27].mxu1  ;;  %v2813_v40 = vmul.f32 0.35355338, %v3893_v37 }
0x1777   :  { %v4324_v39 = vpop.eup %4323  ;;  %v2812_v41 = vmul.f32 0.35355338, %v2803_v38 }
0x1778   :  { %v2540_v21 = vsel %vm407_vm5, %v4324_v39, 0.0  ;;  %v2815_v47 = vadd.f32 %v4350_v20, %v2813_v40 }
0x1779   :  { %2541 = vadd.xlane.f32.xlu0 %v2540_v21  ;;  %v2814_v42 = vadd.f32 %v4349_v25, %v2812_v41 }
0x177a   :  { %v2819_v49 = vsel %vm411_vm6, %v2815_v47, -inf }
0x177b   :  { %v2816_v46 = vsel %vm407_vm5, %v2814_v42, -inf }
0x177c   :  { %2817 = vmax.xlane.f32.xlu1 %v2816_v46  ;;  %v3540_v46 = vld [vmem:[%s5136_s11 + $0x28] sm:$0xff] }
0x1780   :  { %2820 = vmax.xlane.f32.xlu1 %v2819_v49  ;;  %v3542_v49 = vld [vmem:[%s5136_s11 + $0x38] sm:$0xff] }
0x178f   :  { %4248 = vrot.lane.b32.xlu0 %v4880_v58, %s5174_s27 }
0x1806   :  { %v2542_v54 = vpop.xlane.xlu0 %2541 }
0x1807   :  { %4325 = vrcp.f32 %v2542_v54 }
0x1809   :  { %v2818_v53 = vpop.xlane.xlu1 %2817 }
0x180a   :  { %v2822_v59 = vsub.f32 %v2814_v42, %v2818_v53  ;;  %v4249_v63 = vpop.permute.xlu0 %4248  ;;  %v3539_v42 = vld [vmem:[%s5136_s11 + $0x20] sm:$0xff] }
0x180b   :  { %v4251_v2 = vunpack.i.h.bf16 %v4249_v63  ;;  %v4250_v3 = vunpack.i.l.bf16 %v4249_v63  ;;  %v4119_v20 = vpack.c.bf16 %v3540_v46, %v3539_v42  ;;  %v3538_v63 = vld [vmem:[%s5135_s10 + $0x1] ss:$0 sm:$0xff] }
0x180c   :  { %v2824_v61 = vmul.f32 1.442695, %v2822_v59 }
0x180d   :  { %v2821_v60 = vpop.xlane.xlu1 %2820  ;;  %v4101_v6 = vpack.c.bf16 %v4251_v2, %v4250_v3  ;;  %4120 = vmatprep.subr.bf16.mxu1 %v4119_v20 }
0x180e   :  { %v2823_v29 = vsub.f32 %v2815_v47, %v2821_v60  ;;  %4122 = vmatpush3.bf16.msra.mxu1 %v4119_v20  ;;  %v3541_v47 = vld [vmem:[%s5136_s11 + $0x30] sm:$0xff] }
0x180f   :  { %v4123_v50 = vpack.c.bf16 %v3542_v49, %v3541_v47 }
0x1810   :  { %v2826_v62 = vmul.f32 1.442695, %v2823_v29 }
0x1811   :  { %v4326_v7 = vpop.eup %4325  ;;  %4124 = vmatprep.subr.bf16.mxu1 %v4123_v50 }
0x1812   :  { %4327 = vpow2.f32 %v2826_v62  ;;  %v2548_v55 = vmul.f32 %v4326_v7, %v4324_v39  ;;  %4126 = vmatpush3.bf16.msra.mxu1 %v4123_v50 }
0x1813   :  { %4329 = vpow2.f32 %v2824_v61  ;;  %v3537_v61 = vld [vmem:[%s5134_s9 + $0x1] ss:$0 sm:$0xff] }
0x1814   :  { %4331 = vrcp.f32 %v2545_v52 }
0x1815   :  { %v3857_v4 = vpop.f32.mrb[12].mxu0 }
0x1816   :  { %v2262_v5 = vpop.f32.mrb[13].mxu0 }
0x1817   :  { %3860 = vmatprep.mubr.msk.f32.mxu0 %vm319_vm3, %v2262_v5 }
0x1818   :  { %3861 = vmatmul.mubr.msk.f32.vlgmr.msra.gmra.mrb[14].mxu0 %vm319_vm3, %v3857_v4 }
0x1819   :  { %3864 = vmatpush3.msra.mxu0 %v3493_v51  ;;  %3865 = vmatprep.mubr.msk.f32.mxu0 %vm319_vm3, %v4930_v45 }
0x181a   :  { %4103 = vmatprep.subr.msk.bf16.mxu0 %vm4661_vm9, %v4101_v6 }
0x181c   :  { %v4328_v48 = vpop.eup %4327 }
0x181d   :  { %v2831_v56 = vsel %vm411_vm6, %v4328_v48, 0.0  ;;  %v4330_v43 = vpop.eup %4329 }
0x181e   :  { %2832 = vadd.xlane.f32.xlu1 %v2831_v56  ;;  %v4332_v32 = vpop.eup %4331  ;;  %v2828_v45 = vsel %vm407_vm5, %v4330_v43, 0.0  ;;  %v3548_v56 = vld [vmem:[%s5138_s13 + $0x48] sm:$0xff] }
0x181f   :  { %v2549_v8 = vmul.f32 %v4332_v32, %v4958_v22  ;;  %v3549_v32 = vld [vmem:[%s5138_s13 + $0x50] sm:$0xff] }
0x1820   :  { %3866 = vmatmul.mubr.msk.f32.vlgmr.msra.gmra.mrb[14].mxu0 %vm319_vm3, %v4928_v44 }
0x1821   :  { %4106 = vmatpush3.bf16.msk.msra.mxu0 %vm4661_vm9, %v4101_v6  ;;  %3879 = vmatprep.mubr.msk.f32.mxu0 %vm407_vm5, %v2548_v55  ;;  %v3550_v55 = vld [vmem:[%s5138_s13 + $0x58] sm:$0xff] }
0x1822   :  { %2829 = vadd.xlane.f32.xlu1 %v2828_v45  ;;  %3882 = vmatprep.subr.mxu0 %v3495_v9  ;;  %v4131_v45 = vpack.c.bf16 %v3550_v55, %v3549_v32  ;;  %v3559_v32 = vld [vmem:[%s5140_s15] ss:$0 sm:$0xff]  ;;  %s4388_s15 = smov [#allocation2]  }
0x1823   :  { %s3424_s1 = sshll.u32 %s4388_s15, 4  ;;  %s3425_s1 = int_to_ptr.vmem [resolvable:$true] %s3424_s1 }
0x1824   :  { %3880 = vmatmul.mubr.msk.f32.vlgmr.msra.gmra.mrb[16].mxu0 %vm407_vm5, %v2549_v8  ;;  %v3551_v8 = vld [vmem:[%s5138_s13 + $0x60] sm:$0xff]  ;;  %p4356_p1 = scmp.lt.s32.totalorder %s3425_s1, %s3425_s1 }
0x1825   :  { %3883 = vmatpush3.msra.mxu0 %v3495_v9  ;;  %v3552_v9 = vld [vmem:[%s5138_s13 + $0x68] sm:$0xff] }
0x1833   :  { %4253 = vrot.lane.b32.xlu1 %v4880_v58, %s5175_s3 }
0x18ab   :  { %v2833_v44 = vpop.xlane.xlu1 %2832 }
0x18af   :  { %v2830_v10 = vpop.xlane.xlu1 %2829 }
0x18b0   :  { %4333 = vrcp.f32 %v2830_v10  ;;  %v3553_v10 = vld [vmem:[%s5138_s13 + $0x70] sm:$0xff] }
0x18b1   :  { %4335 = vrcp.f32 %v2833_v44  ;;  %v4135_v44 = vpack.c.bf16 %v3552_v9, %v3551_v8 }
0x18b3   :  { %v4254_v11 = vpop.permute.xlu1 %4253 }
0x18b4   :  { %v4256_v12 = vunpack.i.h.bf16 %v4254_v11  ;;  %v4255_v13 = vunpack.i.l.bf16 %v4254_v11  ;;  %v3554_v11 = vld [vmem:[%s5138_s13 + $0x78] sm:$0xff] }
0x18b6   :  { %v4113_v14 = vpack.c.bf16 %v4256_v12, %v4255_v13  ;;  %v4139_v12 = vpack.c.bf16 %v3554_v11, %v3553_v10  ;;  %v3544_v13 = vld [vmem:[%s5137_s12 + $0x1] ss:$0 sm:$0xff] }
0x18b8   :  { %4115 = vmatprep.subr.msk.bf16.mxu0 %vm4661_vm9, %v4113_v14 }
0x18ba   :  { %v4334_v25 = vpop.eup %4333 }
0x18bb   :  { %v4336_v18 = vpop.eup %4335  ;;  %v2836_v22 = vmul.f32 %v4334_v25, %v4330_v43 }
0x18bc   :  { %v2837_v24 = vmul.f32 %v4336_v18, %v4328_v48  ;;  %v3547_v48 = vld [vmem:[%s5138_s13 + $0x40] sm:$0xff] }
0x18bd   :  { %v4127_v43 = vpack.c.bf16 %v3548_v56, %v3547_v48 }
0x18f7   :  { %v3881_v15 = vpop.f32.mrb[16].mxu0 }
0x18f8   :  { %v2629_v58 = vpop.f32.mrb[17].mxu0 }
0x18f9   :  { %3884 = vmatprep.mubr.msk.f32.mxu0 %vm319_vm3, %v2629_v58 }
0x18fa   :  { %3885 = vmatmul.mubr.msk.f32.vlgmr.msra.gmra.mrb[14].mxu0 %vm319_vm3, %v3881_v15 }
0x18fb   :  { %4118 = vmatpush3.bf16.msk.msra.mxu0 %vm4661_vm9, %v4113_v14  ;;  %3898 = vmatprep.mubr.msk.f32.mxu0 %vm407_vm5, %v2836_v22 }
0x18fc   :  { %3901 = vmatprep.subr.mxu0 %v3496_v23 }
0x18fe   :  { %3899 = vmatmul.mubr.msk.f32.vlgmr.msra.gmra.mrb[18].mxu0 %vm407_vm5, %v2837_v24 }
0x18ff   :  { %3902 = vmatpush3.msra.mxu0 %v3496_v23 }
0x1900   :  { %4128 = vmatprep.subr.bf16.mxu0 %v4127_v43 }
0x19d1   :  { %v3900_v26 = vpop.f32.mrb[18].mxu0 }
0x19d2   :  { %v2917_v19 = vpop.f32.mrb[19].mxu0 }
0x19d3   :  { %3903 = vmatprep.mubr.msk.f32.mxu0 %vm319_vm3, %v2917_v19 }
0x19d4   :  { %3904 = vmatmul.mubr.msk.f32.vlgmr.msra.gmra.mrb[14].mxu0 %vm319_vm3, %v3900_v26 }
0x19d5   :  { %4130 = vmatpush3.bf16.msra.mxu0 %v4127_v43 }
0x19d6   :  { %4132 = vmatprep.subr.bf16.mxu0 %v4131_v45 }
0x19d9   :  { %4134 = vmatpush3.bf16.msra.mxu0 %v4131_v45  ;;  %v3560_v45 = vld [vmem:[%s5141_s16] ss:$0 sm:$0xff]  ;;  %s4351_s16 = scalar_lea.vmem %s3425_s1, 32 }
0x19da   :  { %4136 = vmatprep.subr.bf16.mxu0 %v4135_v44  ;;  %p4352_p0 = scmp.ne.s32.totalorder %s3425_s1, %s4351_s16  ;;  %p4357_p2 = scmp.lt.s32.totalorder %s4351_s16, %s4351_s16 }
0x19dc   :  { %p4358_p3 = por %p4357_p2, %p4356_p1 }
0x19dd   :  { %4138 = vmatpush3.bf16.msra.mxu0 %v4135_v44 }
0x19de   :  { %4140 = vmatprep.subr.bf16.mxu0 %v4139_v12  ;;  %p4359_p4 = pnand %p4358_p3, %p4352_p0 }
0x19e1   :  { %4142 = vmatpush3.bf16.msra.mxu0 %v4139_v12 }
0x1aa7   :  { %v3905_v27 = vpop.f32.mrb[14].mxu0 }
0x1aa8   :  { %v3010_v57 = vadd.f32 %v3905_v27, %v4842_v17  ;;  %v2998_v1 = vpop.f32.mrb[15].mxu0 }
0x1aa9   :  { %v3009_v0 = vadd.f32 %v2998_v1, %v4839_v16 }
0x1aaa   :  { %v5020_v30 = vadd.f32 %v3534_v28, %v3010_v57 }
0x1aab   :  { %v5022_v31 = vadd.f32 %v3534_v28, %v3009_v0 }
0x1aac   :  { %v3028_v33 = vsel %vm183_vm2, %v5020_v30, 0.0 }
0x1aad   :  { %3029 = vadd.xlane.f32.xlu1 %v3028_v33  ;;  %v3025_v34 = vsel %vm179_vm1, %v5022_v31, 0.0 }
0x1aae   :  { %3026 = vadd.xlane.f32.xlu0 %v3025_v34 }
0x1b3a   :  { %v3030_v35 = vpop.xlane.xlu1 %3029 }
0x1b3b   :  { %v3032_v36 = vmul.f32 0.03125, %v3030_v35  ;;  %v3027_v37 = vpop.xlane.xlu0 %3026 }
0x1b3c   :  { %v3031_v38 = vmul.f32 0.03125, %v3027_v37 }
0x1b3d   :  { %v3034_v17 = vsub.f32 %v5020_v30, %v3032_v36 }
0x1b3e   :  { %v3033_v16 = vsub.f32 %v5022_v31, %v3031_v38 }
0x1b3f   :  { %v3036_v41 = vmul.f32 %v3034_v17, %v3034_v17 }
0x1b40   :  { %v3035_v39 = vmul.f32 %v3033_v16, %v3033_v16 }
0x1b41   :  { %v3040_v21 = vsel %vm183_vm2, %v3036_v41, 0.0 }
0x1b42   :  { %v3037_v40 = vsel %vm179_vm1, %v3035_v39, 0.0 }
0x1b43   :  { %3038 = vadd.xlane.f32.xlu0 %v3037_v40 }
0x1b47   :  { %3041 = vadd.xlane.f32.xlu0 %v3040_v21 }
0x1bd0   :  { %v3039_v51 = vpop.xlane.xlu0 %3038 }
0x1bd1   :  { %v3043_v52 = vmul.f32 0.03125, %v3039_v51 }
0x1bd3   :  { %v3045_v53 = vadd.f32 1e-05, %v3043_v52 }
0x1bd4   :  { %v3042_v54 = vpop.xlane.xlu0 %3041 }
0x1bd5   :  { %4337 = vrsqrt.f32 %v3045_v53  ;;  %v3044_v59 = vmul.f32 0.03125, %v3042_v54 }
0x1bd7   :  { %v3046_v60 = vadd.f32 1e-05, %v3044_v59 }
0x1bd9   :  { %4339 = vrsqrt.f32 %v3046_v60 }
0x1bdf   :  { %v4338_v29 = vpop.eup %4337 }
0x1be0   :  { %v3049_v62 = vmul.f32 %v4338_v29, %v3033_v16  ;;  %v3556_v16 = vld [vmem:[%s5139_s14 + $0x1] ss:$0 sm:$0xff] }
0x1be2   :  { %v3057_v2 = vmul.f32 %v3537_v61, %v3049_v62 }
0x1be3   :  { %v4340_v3 = vpop.eup %4339 }
0x1be4   :  { %v3050_v4 = vmul.f32 %v4340_v3, %v3034_v17  ;;  %v3065_v5 = vadd.f32 %v3538_v63, %v3057_v2  ;;  %v3326_v2 = vld [vmem:[%s5142_s17 + $0x18] sm:$0xff] }
0x1be6   :  { %v3058_v6 = vmul.f32 %v3537_v61, %v3050_v4  ;;  %3914 = vmatprep.mubr.msk.f32.mxu1 %vm179_vm1, %v3065_v5  ;;  %v3324_v61 = vld [vmem:[%s5142_s17 + $0x8] sm:$0xff] }
0x1be8   :  { %v3066_v7 = vadd.f32 %v3538_v63, %v3058_v6  ;;  %v3325_v63 = vld [vmem:[%s5142_s17 + $0x10] sm:$0xff] }
0x1be9   :  { %v4147_v3 = vpack.c.bf16 %v3326_v2, %v3325_v63 }
0x1bea   :  { %3915 = vmatmul.mubr.msk.f32.vlgmr.msra.gmra.mrb[28].mxu1 %vm179_vm1, %v3066_v7 }
0x1cbd   :  { %v3916_v14 = vpop.f32.mrb[28].mxu1 }
0x1cbe   :  { %v3158_v25 = vadd.f32 %v3916_v14, %v3544_v13  ;;  %v3152_v15 = vpop.f32.mrb[29].mxu1 }
0x1cbf   :  { %v3153_v58 = vadd.f32 %v3544_v13, %v3152_v15  ;;  %v3561_v13 = vld [vmem:[%s5143_s18] ss:$0 sm:$0xff] }
0x1cc0   :  { %v3162_v18 = vmul.f32 0.044715, %v3158_v25  ;;  %v3172_v37 = vmul.f32 0.5, %v3158_v25 }
0x1cc1   :  { %v3161_v22 = vmul.f32 0.044715, %v3153_v58  ;;  %v3171_v35 = vmul.f32 0.5, %v3153_v58 }
0x1cc2   :  { %v3164_v23 = vmul.f32 %v3162_v18, %v3158_v25 }
0x1cc3   :  { %v3163_v24 = vmul.f32 %v3161_v22, %v3153_v58 }
0x1cc4   :  { %v3166_v26 = vmul.f32 %v3164_v23, %v3158_v25 }
0x1cc5   :  { %v3165_v19 = vmul.f32 %v3163_v24, %v3153_v58 }
0x1cc6   :  { %v3168_v27 = vadd.f32 %v3166_v26, %v3158_v25 }
0x1cc7   :  { %v3167_v28 = vadd.f32 %v3165_v19, %v3153_v58 }
0x1cc8   :  { %v3170_v57 = vmul.f32 0.7978846, %v3168_v27 }
0x1cc9   :  { %v3169_v1 = vmul.f32 0.7978846, %v3167_v28 }
0x1cca   :  { %4341 = vtanh.f32 %v3170_v57 }
0x1ccb   :  { %4343 = vtanh.f32 %v3169_v1 }
0x1cd4   :  { %v4342_v0 = vpop.eup %4341 }
0x1cd5   :  { %v4344_v33 = vpop.eup %4343  ;;  %v3176_v34 = vadd.f32 1.0, %v4342_v0 }
0x1cd6   :  { %v3175_v36 = vadd.f32 1.0, %v4344_v33 }
0x1cd7   :  { %v3178_v17 = vmul.f32 %v3176_v34, %v3172_v37 }
0x1cd8   :  { %v3177_v38 = vmul.f32 %v3175_v36, %v3171_v35 }
0x1cda   :  { %3933 = vmatprep.mubr.msk.f32.mxu0 %vm93_vm0, %v3177_v38 }
0x1cdb   :  { %3934 = vmatmul.mubr.msk.f32.vlgmr.msra.gmra.mrb[20].mxu0 %vm93_vm0, %v3178_v17 }
0x1dae   :  { %v3935_v39 = vpop.f32.mrb[20].mxu0 }
0x1daf   :  { %v3268_v40 = vpop.f32.mrb[21].mxu0  ;;  %v3274_v41 = vadd.f32 %v3935_v39, %v3556_v16 }
0x1db0   :  { %v3269_v21 = vadd.f32 %v3556_v16, %v3268_v40 }
0x1db1   :  { %v3278_v20 = vadd.f32 %v3274_v41, %v5020_v30  ;;  %v3323_v30 = vld [vmem:[%s5142_s17] sm:$0xff] }
0x1db2   :  { %v3277_v42 = vadd.f32 %v3269_v21, %v5022_v31  ;;  %v4143_v62 = vpack.c.bf16 %v3324_v61, %v3323_v30 }
0x1db3   :  { %v3284_v47 = vsel %vm183_vm2, %v3278_v20, 0.0 }
0x1db4   :  { %v3281_v46 = vsel %vm179_vm1, %v3277_v42, 0.0  ;;  %4144 = vmatprep.subr.bf16.mxu1 %v4143_v62 }
0x1db5   :  { %3282 = vadd.xlane.f32.xlu0 %v3281_v46  ;;  %4146 = vmatpush3.bf16.msra.mxu1 %v4143_v62 }
0x1db6   :  { %4148 = vmatprep.subr.bf16.mxu1 %v4147_v3 }
0x1db9   :  { %3285 = vadd.xlane.f32.xlu0 %v3284_v47  ;;  %4150 = vmatpush3.bf16.msra.mxu1 %v4147_v3 }
0x1e42   :  { %v3283_v49 = vpop.xlane.xlu0 %3282 }
0x1e43   :  { %v3287_v50 = vmul.f32 0.03125, %v3283_v49 }
0x1e45   :  { %v3289_v51 = vsub.f32 %v3277_v42, %v3287_v50 }
0x1e46   :  { %v3286_v52 = vpop.xlane.xlu0 %3285 }
0x1e47   :  { %v3288_v53 = vmul.f32 0.03125, %v3286_v52  ;;  %v3291_v54 = vmul.f32 %v3289_v51, %v3289_v51 }
0x1e49   :  { %v3290_v59 = vsub.f32 %v3278_v20, %v3288_v53  ;;  %v3293_v60 = vsel %vm179_vm1, %v3291_v54, 0.0 }
0x1e4a   :  { %3294 = vadd.xlane.f32.xlu0 %v3293_v60 }
0x1e4b   :  { %v3292_v29 = vmul.f32 %v3290_v59, %v3290_v59 }
0x1e4d   :  { %v3296_v31 = vsel %vm183_vm2, %v3292_v29, 0.0 }
0x1e4e   :  { %3297 = vadd.xlane.f32.xlu1 %v3296_v31 }
0x1ed7   :  { %v3295_v4 = vpop.xlane.xlu0 %3294 }
0x1ed8   :  { %v3299_v5 = vmul.f32 0.03125, %v3295_v4 }
0x1eda   :  { %v3301_v6 = vadd.f32 1e-05, %v3299_v5 }
0x1edb   :  { %v3298_v7 = vpop.xlane.xlu1 %3297 }
0x1edc   :  { %4345 = vrsqrt.f32 %v3301_v6  ;;  %v3300_v48 = vmul.f32 0.03125, %v3298_v7 }
0x1ede   :  { %v3302_v56 = vadd.f32 1e-05, %v3300_v48 }
0x1ee0   :  { %4347 = vrsqrt.f32 %v3302_v56 }
0x1ee6   :  { %v4346_v43 = vpop.eup %4345 }
0x1ee7   :  { %v3305_v55 = vmul.f32 %v4346_v43, %v3289_v51 }
0x1ee9   :  { %v3313_v8 = vmul.f32 %v3559_v32, %v3305_v55 }
0x1eea   :  { %v4348_v9 = vpop.eup %4347 }
0x1eeb   :  { %v3306_v44 = vmul.f32 %v4348_v9, %v3290_v59  ;;  %v3321_v10 = vadd.f32 %v3560_v45, %v3313_v8 }
0x1eed   :  { %v3314_v11 = vmul.f32 %v3559_v32, %v3306_v44  ;;  %3944 = vmatprep.mubr.msk.f32.mxu1 %vm179_vm1, %v3321_v10 }
0x1eef   :  { %v3322_v12 = vadd.f32 %v3560_v45, %v3314_v11 }
0x1ef1   :  { %3945 = vmatmul.mubr.msk.f32.vlgmr.msra.gmra.mrb[30].mxu1 %vm179_vm1, %v3322_v12 }
0x1fc4   :  { %v3946_v14 = vpop.f32.mrb[30].mxu1 }
0x1fc5   :  { %v3406_v25 = vpop.f32.mrb[31].mxu1 }
0x1fc6   :  { %v3407_v15 = vadd.f32 %v3561_v13, %v3406_v25 }
0x1fc8   :  { %3415 = vst.msk [vmem:[#allocation2] sm:$0x1] %vm3414_vm10, %v3407_v15 }
0x1fc9   :  { %3417 = vst.msk [vmem:[#allocation2 - $0x4] sm:$0x20] %vm3416_vm11, %v3407_v15 }
0x1fca   :  { %4362 = shalt.err (!%p4359_p4)
}
0x1fcb   :  { %s4363_s18 = scalar_lea.hbm %s5144_s19, 32 }
0x1fcc   :  { %p4364_p5 = scmp.ne.s32.totalorder %s5144_s19, %s4363_s18  ;;  %p4367_p6 = scmp.lt.u32.totalorder %s4363_s18, %s5144_s19 }
0x1fce   :  { %p4369_p7 = pnand %p4367_p6, %p4364_p5 }
0x1fd0   :  { %4372 = shalt.err (!%p4369_p7)
}
0x1fd1   :  { %3427 = dma.vmem_to_hbm [thread:$0]  %s3425_s1, 32, %s5144_s19, [#allocation3]  }
0x1fd2   :  { %4373 = dma.done.wait [#allocation3], 32  }
0x1fd3   :  { %4374 = vsyncadd [#allocation3], 4294967264 }
0x1fd4   :  { %3431 = vsyncpa [#allocation3], 1 }

</bundles_post_ra>
